<compile_context>
chip_gen: v5e
topology: v5e:2x2
jax: 0.10.0
libtpu: 0.0.40
codegen_flags: <defaults>
</compile_context>

<pallas_src>
import math

import numpy as np
import jax
import jax.numpy as jnp
from jax import lax
from jax.experimental import pallas as pl
from jax.experimental.pallas import tpu as pltpu


# -----------------------------------------------------------------------------
# In-kernel sine: range-reduced odd polynomial (floor + mul/add only), so the
# hybrid head stays inside the fused kernel without relying on a transcendental
# sine lowering.  |error| < 1e-6 after reduction to [-pi/2, pi/2].
# -----------------------------------------------------------------------------
def _sin(x):
    pi = math.pi
    k = jnp.floor(x * (1.0 / pi) + 0.5)                 # nearest integer to x/pi
    r = x - k * pi                                      # r in [-pi/2, pi/2]
    sgn = 1.0 - 4.0 * (0.5 * k - jnp.floor(0.5 * k))    # (-1)**k, float-only parity
    r2 = r * r
    s = r * (1.0 + r2 * (-1.0 / 6.0
             + r2 * (1.0 / 120.0
             + r2 * (-1.0 / 5040.0
             + r2 * (1.0 / 362880.0
             + r2 * (-1.0 / 39916800.0))))))
    return sgn * s


# -----------------------------------------------------------------------------
# The fused forward kernel.
#
# Layouts (all f32):
#   x_ref : (28, 28)                                   raw image
#   a_ref : (281, 72)   conv1 banded mats              rows [i*28:(i+1)*28]      = even-W half, shift i
#                                                      rows [140+i*28:140+(i+1)*28] = odd-W half, shift i
#                                                      row  280                  = bias (lane = o*12 + w')
#   b_ref : (980, 64)   conv2 banded mats + fc weights rows [0:360] even-W2, [360:720] odd-W2 halves
#                                                      row 720 = conv2 bias (lane = co*4 + w'')
#                                                      rows [721:977] = fc1 weights (256, 64)
#                                                      row 977 = fc1 bias, 978 = fc2 weights, [979,0] = fc2 bias
#   p1    : (24, 72)    conv1+ReLU, W-pooled           lane = o*12 + w'
#   q1    : (12, 72)    pool1 output                   lane = o*12 + w'
#   p2    : (8, 64)     conv2+ReLU, W-pooled           lane = co*4 + w''
#   fcin  : (1, 256)    fc1 input row                  lane = h''*64 + co*4 + w''
# -----------------------------------------------------------------------------
def _net_kernel(x_ref, a_ref, b_ref, o_ref, p1, q1, p2, fcin):
    # ---- conv1 (1 -> 6, k=5) + bias + ReLU, fused with the W half of pool1 ---
    # 2 x 5 accumulating MXU dots of the vertically shifted image slabs against
    # banded weight matrices (one per output-column parity).
    acc_e = jnp.zeros((24, 72), jnp.float32)
    acc_o = jnp.zeros((24, 72), jnp.float32)
    for i in range(5):
        lhs = x_ref[i:i + 24, :]                                         # (24, 28)
        acc_e = acc_e + jnp.dot(lhs, a_ref[i * 28:(i + 1) * 28, :],
                                preferred_element_type=jnp.float32)
        acc_o = acc_o + jnp.dot(lhs, a_ref[140 + i * 28:140 + (i + 1) * 28, :],
                                preferred_element_type=jnp.float32)
    # max/ReLU commute and the bias is constant within a pooled pair, so the
    # W direction of max_pool2d(2) is just an elementwise max of the halves.
    p1[...] = jnp.maximum(jnp.maximum(acc_e, acc_o) + a_ref[280:281, :], 0.0)

    # ---- pool1, H direction: sublane-strided reads ----------------------------
    q1[...] = jnp.maximum(p1[pl.ds(0, 12, stride=2), :],
                          p1[pl.ds(1, 12, stride=2), :])                 # (12, 72)

    # ---- conv2 (6 -> 16, k=5) + bias + ReLU, fused with the W half of pool2 --
    acc2e = jnp.zeros((8, 64), jnp.float32)
    acc2o = jnp.zeros((8, 64), jnp.float32)
    for i in range(5):
        lhs = q1[i:i + 8, :]                                             # (8, 72)
        acc2e = acc2e + jnp.dot(lhs, b_ref[i * 72:(i + 1) * 72, :],
                                preferred_element_type=jnp.float32)
        acc2o = acc2o + jnp.dot(lhs, b_ref[360 + i * 72:360 + (i + 1) * 72, :],
                                preferred_element_type=jnp.float32)
    p2[...] = jnp.maximum(jnp.maximum(acc2e, acc2o) + b_ref[720:721, :], 0.0)

    # ---- pool2, H direction ----------------------------------------------------
    m2 = jnp.maximum(p2[pl.ds(0, 4, stride=2), :],
                     p2[pl.ds(1, 4, stride=2), :])                       # (4, 64)

    # ---- dropout2d: eval-mode identity ----------------------------------------
    # TODO(synk): training-mode stochastic channel masking not implemented.

    # ---- fc1 + ReLU: lane-dense (1,256) row, then ONE (1,256)@(256,64) dot ----
    # The CHW flatten of the PyTorch module is absorbed into the host-permuted
    # fc1 weight rows, so the pooled rows are simply laid side by side.
    for h in range(4):
        fcin[0:1, h * 64:(h + 1) * 64] = m2[h:h + 1, :]
    h1 = jnp.dot(fcin[...], b_ref[721:977, :], preferred_element_type=jnp.float32)
    h1 = jnp.maximum(h1 + b_ref[977:978, :], 0.0)                        # (1, 64)

    # ---- fc2 -> theta (lane reduction) -----------------------------------------
    theta = jnp.sum(h1 * b_ref[978:979, :], axis=1, keepdims=True) + b_ref[979:980, 0:1]

    # ---- hybrid: H ; RY(theta) ; measure  ->  P(|1>) = (1 + sin(theta)) / 2 ----
    prob = 0.5 * (1.0 + _sin(theta))                                     # (1, 1)

    # ---- cat((p, 1 - p), -1): single store -------------------------------------
    colf = lax.broadcasted_iota(jnp.int32, (1, 2), 1).astype(jnp.float32)
    o_ref[...] = prob * (1.0 - colf) + (1.0 - prob) * colf


# -----------------------------------------------------------------------------
# Wrapper: one pallas_call, no grid (everything fits trivially in VMEM).
# -----------------------------------------------------------------------------
_VMEM_SPEC = pl.BlockSpec(memory_space=pltpu.MemorySpace.VMEM)


@jax.jit
def net_forward(x_nchw, kp):
    """x_nchw: (1, 1, 28, 28) float32; kp: packed kernel params (prepare_params)."""
    x = x_nchw[0, 0].astype(jnp.float32)                                 # (28, 28)
    return pl.pallas_call(
        _net_kernel,
        out_shape=jax.ShapeDtypeStruct((1, 2), jnp.float32),
        in_specs=[_VMEM_SPEC, _VMEM_SPEC, _VMEM_SPEC],
        out_specs=_VMEM_SPEC,
        scratch_shapes=[
            pltpu.VMEM((24, 72), jnp.float32),    # conv1 + relu, W-pooled
            pltpu.VMEM((12, 72), jnp.float32),    # pool1 output
            pltpu.VMEM((8, 64), jnp.float32),     # conv2 + relu, W-pooled
            pltpu.VMEM((1, 256), jnp.float32),    # fc1 input row
        ],
    )(x, kp["A"], kp["B"])


# -----------------------------------------------------------------------------
# One-time conversion of PyTorch-layout parameters into two packed, pre-laid-out
# buffers of banded conv matrices + permuted fc weights (all the flatten /
# permutation work happens here, once, on the host).
# -----------------------------------------------------------------------------
def prepare_params(p):
    w1 = np.asarray(p["conv1_w"], np.float32)    # (6, 1, 5, 5)
    b1 = np.asarray(p["conv1_b"], np.float32)    # (6,)
    w2 = np.asarray(p["conv2_w"], np.float32)    # (16, 6, 5, 5)
    b2 = np.asarray(p["conv2_b"], np.float32)    # (16,)
    fw1 = np.asarray(p["fc1_w"], np.float32)     # (64, 256)
    fb1 = np.asarray(p["fc1_b"], np.float32)     # (64,)
    fw2 = np.asarray(p["fc2_w"], np.float32)     # (1, 64)
    fb2 = np.asarray(p["fc2_b"], np.float32)     # (1,)

    # conv1 banded matrices: out_half[h, o*12 + w'] = sum_i (x[i:i+24,:] @ A_i)[h, .]
    # with A_even_i[(2w'+j),   o*12+w'] = w1[o,0,i,j]
    #      A_odd_i [(2w'+1+j), o*12+w'] = w1[o,0,i,j]
    buf_a = np.zeros((281, 72), np.float32)
    for o in range(6):
        for wp in range(12):
            lane = o * 12 + wp
            for par in range(2):
                w = 2 * wp + par
                base = par * 140
                for i in range(5):
                    for j in range(5):
                        buf_a[base + i * 28 + (w + j), lane] = w1[o, 0, i, j]
        buf_a[280, o * 12:o * 12 + 12] = b1[o]

    # conv2 banded matrices (input lane = ci*12 + w', output lane = co*4 + w''),
    # plus fc1 / fc2 weights packed underneath.
    buf_b = np.zeros((980, 64), np.float32)
    for co in range(16):
        for wp in range(4):
            lane = co * 4 + wp
            for par in range(2):
                w = 2 * wp + par
                base = par * 360
                for ci in range(6):
                    for i in range(5):
                        for j in range(5):
                            buf_b[base + i * 72 + ci * 12 + (w + j), lane] = w2[co, ci, i, j]
        buf_b[720, co * 4:co * 4 + 4] = b2[co]
    # fc1: fc_in lane = h*64 + co*4 + w''  <->  torch flatten index co*16 + h*4 + w''
    for co in range(16):
        for h in range(4):
            for wp in range(4):
                buf_b[721 + h * 64 + co * 4 + wp, :] = fw1[:, co * 16 + h * 4 + wp]
    buf_b[977, :] = fb1
    buf_b[978, :] = fw2[0, :]
    buf_b[979, 0] = fb2[0]

    return {"A": jnp.asarray(buf_a), "B": jnp.asarray(buf_b)}


# -----------------------------------------------------------------------------
# Deterministic parameter init (PyTorch-like uniform fan-in init).
# -----------------------------------------------------------------------------
def init_params(key):
    ks = jax.random.split(key, 8)

    def u(k, shape, fan_in):
        bound = 1.0 / float(fan_in) ** 0.5
        return jax.random.uniform(k, shape, jnp.float32, -bound, bound)

    return {
        "conv1_w": u(ks[0], (6, 1, 5, 5), 1 * 5 * 5),
        "conv1_b": u(ks[1], (6,), 1 * 5 * 5),
        "conv2_w": u(ks[2], (16, 6, 5, 5), 6 * 5 * 5),
        "conv2_b": u(ks[3], (16,), 6 * 5 * 5),
        "fc1_w":   u(ks[4], (64, 256), 256),
        "fc1_b":   u(ks[5], (64,), 256),
        "fc2_w":   u(ks[6], (1, 64), 64),
        "fc2_b":   u(ks[7], (1,), 64),
    }


# -----------------------------------------------------------------------------
# Pure-JAX reference of the PyTorch module (eval mode), full-precision matmuls.
# -----------------------------------------------------------------------------
def _reference_forward(x_nchw, p):
    hi = jax.lax.Precision.HIGHEST

    def conv2d(img_hwc, w_oihw, b):
        out = lax.conv_general_dilated(
            img_hwc[None], w_oihw, (1, 1), "VALID",
            dimension_numbers=("NHWC", "OIHW", "NHWC"), precision=hi)[0]
        return out + b

    x = x_nchw[0, 0]
    y = jnp.maximum(conv2d(x[:, :, None], p["conv1_w"], p["conv1_b"]), 0.0)  # (24,24,6)
    y = jnp.max(y.reshape(12, 2, 12, 2, 6), axis=(1, 3))                     # (12,12,6)
    y = jnp.maximum(conv2d(y, p["conv2_w"], p["conv2_b"]), 0.0)              # (8,8,16)
    y = jnp.max(y.reshape(4, 2, 4, 2, 16), axis=(1, 3))                      # (4,4,16)
    flat = jnp.transpose(y, (2, 0, 1)).reshape(1, 256)                       # CHW flatten
    h = jnp.maximum(jnp.dot(flat, p["fc1_w"].T, precision=hi) + p["fc1_b"], 0.0)
    theta = jnp.dot(h, p["fc2_w"].T, precision=hi) + p["fc2_b"]
    prob = 0.5 * (1.0 + jnp.sin(theta))
    return jnp.concatenate([prob, 1.0 - prob], axis=-1)


if __name__ == "__main__":
    key = jax.random.PRNGKey(0)
    pkey, xkey = jax.random.split(key)
    params = init_params(pkey)
    kparams = prepare_params(params)

    # fc1(256 -> 64) + the two 5x5 convs/pools imply a (1, 1, 28, 28) input.
    x = jax.random.normal(xkey, (1, 1, 28, 28), dtype=jnp.float32)

    out = jax.block_until_ready(net_forward(x, kparams))

    assert out.shape == (1, 2)
    # the two outputs are (p, 1 - p)
    assert abs(float(out.sum()) - 1.0) < 1e-5

    ref = _reference_forward(x, params)
    # Tightened from 2e-2; 2e-3 leaves headroom for the MXU's f32 matmul path
    # while still catching any real layout / indexing regression.
    assert jnp.allclose(out, ref, atol=2e-3), (out, ref)

    print("KERNEL_OK")
</pallas_src>

<mosaic_0001>
module attributes {stable_mosaic.version = 11 : i64} {
  func.func @_net_kernel(%arg0: memref<28x28xf32, #tpu.memory_space<vmem>>, %arg1: memref<281x72xf32, #tpu.memory_space<vmem>>, %arg2: memref<980x64xf32, #tpu.memory_space<vmem>>, %arg3: memref<1x2xf32, #tpu.memory_space<vmem>>, %arg4: memref<24x72xf32, #tpu.memory_space<vmem>>, %arg5: memref<12x72xf32, #tpu.memory_space<vmem>>, %arg6: memref<8x64xf32, #tpu.memory_space<vmem>>, %arg7: memref<1x256xf32, #tpu.memory_space<vmem>>) attributes {dimension_semantics = [], scalar_prefetch = 0 : i64, scratch_operands = 4 : i64, tpu.core_type = #tpu.core_type<tc>} {
    %cst = arith.constant 0.000000e+00 : f32
    %0 = vector.broadcast %cst : f32 to vector<24x72xf32>
    %cst_0 = arith.constant 0.000000e+00 : f32
    %1 = vector.broadcast %cst_0 : f32 to vector<24x72xf32>
    %c0 = arith.constant 0 : index
    %c0_1 = arith.constant 0 : index
    %2 = vector.load %arg0[%c0, %c0_1] : memref<28x28xf32, #tpu.memory_space<vmem>>, vector<24x28xf32>
    %c0_2 = arith.constant 0 : index
    %c0_3 = arith.constant 0 : index
    %3 = vector.load %arg1[%c0_2, %c0_3] : memref<281x72xf32, #tpu.memory_space<vmem>>, vector<28x72xf32>
    %cst_4 = arith.constant dense<0.000000e+00> : vector<24x72xf32>
    %4 = tpu.matmul %2, %3, %cst_4 {dimension_numbers = #tpu.dot_dimension_numbers<[1], [0], [0], [1], [0, 0, 1, 1], [], []>} : vector<24x28xf32>, vector<28x72xf32>, vector<24x72xf32> -> vector<24x72xf32>
    %5 = arith.addf %0, %4 : vector<24x72xf32>
    %c140 = arith.constant 140 : index
    %c0_5 = arith.constant 0 : index
    %6 = vector.load %arg1[%c140, %c0_5] : memref<281x72xf32, #tpu.memory_space<vmem>>, vector<28x72xf32>
    %cst_6 = arith.constant dense<0.000000e+00> : vector<24x72xf32>
    %7 = tpu.matmul %2, %6, %cst_6 {dimension_numbers = #tpu.dot_dimension_numbers<[1], [0], [0], [1], [0, 0, 1, 1], [], []>} : vector<24x28xf32>, vector<28x72xf32>, vector<24x72xf32> -> vector<24x72xf32>
    %8 = arith.addf %1, %7 : vector<24x72xf32>
    %c1 = arith.constant 1 : index
    %c0_7 = arith.constant 0 : index
    %9 = vector.load %arg0[%c1, %c0_7] : memref<28x28xf32, #tpu.memory_space<vmem>>, vector<24x28xf32>
    %c28 = arith.constant 28 : index
    %c0_8 = arith.constant 0 : index
    %10 = vector.load %arg1[%c28, %c0_8] : memref<281x72xf32, #tpu.memory_space<vmem>>, vector<28x72xf32>
    %cst_9 = arith.constant dense<0.000000e+00> : vector<24x72xf32>
    %11 = tpu.matmul %9, %10, %cst_9 {dimension_numbers = #tpu.dot_dimension_numbers<[1], [0], [0], [1], [0, 0, 1, 1], [], []>} : vector<24x28xf32>, vector<28x72xf32>, vector<24x72xf32> -> vector<24x72xf32>
    %12 = arith.addf %5, %11 : vector<24x72xf32>
    %c168 = arith.constant 168 : index
    %c0_10 = arith.constant 0 : index
    %13 = vector.load %arg1[%c168, %c0_10] : memref<281x72xf32, #tpu.memory_space<vmem>>, vector<28x72xf32>
    %cst_11 = arith.constant dense<0.000000e+00> : vector<24x72xf32>
    %14 = tpu.matmul %9, %13, %cst_11 {dimension_numbers = #tpu.dot_dimension_numbers<[1], [0], [0], [1], [0, 0, 1, 1], [], []>} : vector<24x28xf32>, vector<28x72xf32>, vector<24x72xf32> -> vector<24x72xf32>
    %15 = arith.addf %8, %14 : vector<24x72xf32>
    %c2 = arith.constant 2 : index
    %c0_12 = arith.constant 0 : index
    %16 = vector.load %arg0[%c2, %c0_12] : memref<28x28xf32, #tpu.memory_space<vmem>>, vector<24x28xf32>
    %c56 = arith.constant 56 : index
    %c0_13 = arith.constant 0 : index
    %17 = vector.load %arg1[%c56, %c0_13] : memref<281x72xf32, #tpu.memory_space<vmem>>, vector<28x72xf32>
    %cst_14 = arith.constant dense<0.000000e+00> : vector<24x72xf32>
    %18 = tpu.matmul %16, %17, %cst_14 {dimension_numbers = #tpu.dot_dimension_numbers<[1], [0], [0], [1], [0, 0, 1, 1], [], []>} : vector<24x28xf32>, vector<28x72xf32>, vector<24x72xf32> -> vector<24x72xf32>
    %19 = arith.addf %12, %18 : vector<24x72xf32>
    %c196 = arith.constant 196 : index
    %c0_15 = arith.constant 0 : index
    %20 = vector.load %arg1[%c196, %c0_15] : memref<281x72xf32, #tpu.memory_space<vmem>>, vector<28x72xf32>
    %cst_16 = arith.constant dense<0.000000e+00> : vector<24x72xf32>
    %21 = tpu.matmul %16, %20, %cst_16 {dimension_numbers = #tpu.dot_dimension_numbers<[1], [0], [0], [1], [0, 0, 1, 1], [], []>} : vector<24x28xf32>, vector<28x72xf32>, vector<24x72xf32> -> vector<24x72xf32>
    %22 = arith.addf %15, %21 : vector<24x72xf32>
    %c3 = arith.constant 3 : index
    %c0_17 = arith.constant 0 : index
    %23 = vector.load %arg0[%c3, %c0_17] : memref<28x28xf32, #tpu.memory_space<vmem>>, vector<24x28xf32>
    %c84 = arith.constant 84 : index
    %c0_18 = arith.constant 0 : index
    %24 = vector.load %arg1[%c84, %c0_18] : memref<281x72xf32, #tpu.memory_space<vmem>>, vector<28x72xf32>
    %cst_19 = arith.constant dense<0.000000e+00> : vector<24x72xf32>
    %25 = tpu.matmul %23, %24, %cst_19 {dimension_numbers = #tpu.dot_dimension_numbers<[1], [0], [0], [1], [0, 0, 1, 1], [], []>} : vector<24x28xf32>, vector<28x72xf32>, vector<24x72xf32> -> vector<24x72xf32>
    %26 = arith.addf %19, %25 : vector<24x72xf32>
    %c224 = arith.constant 224 : index
    %c0_20 = arith.constant 0 : index
    %27 = vector.load %arg1[%c224, %c0_20] : memref<281x72xf32, #tpu.memory_space<vmem>>, vector<28x72xf32>
    %cst_21 = arith.constant dense<0.000000e+00> : vector<24x72xf32>
    %28 = tpu.matmul %23, %27, %cst_21 {dimension_numbers = #tpu.dot_dimension_numbers<[1], [0], [0], [1], [0, 0, 1, 1], [], []>} : vector<24x28xf32>, vector<28x72xf32>, vector<24x72xf32> -> vector<24x72xf32>
    %29 = arith.addf %22, %28 : vector<24x72xf32>
    %c4 = arith.constant 4 : index
    %c0_22 = arith.constant 0 : index
    %30 = vector.load %arg0[%c4, %c0_22] : memref<28x28xf32, #tpu.memory_space<vmem>>, vector<24x28xf32>
    %c112 = arith.constant 112 : index
    %c0_23 = arith.constant 0 : index
    %31 = vector.load %arg1[%c112, %c0_23] : memref<281x72xf32, #tpu.memory_space<vmem>>, vector<28x72xf32>
    %cst_24 = arith.constant dense<0.000000e+00> : vector<24x72xf32>
    %32 = tpu.matmul %30, %31, %cst_24 {dimension_numbers = #tpu.dot_dimension_numbers<[1], [0], [0], [1], [0, 0, 1, 1], [], []>} : vector<24x28xf32>, vector<28x72xf32>, vector<24x72xf32> -> vector<24x72xf32>
    %33 = arith.addf %26, %32 : vector<24x72xf32>
    %c252 = arith.constant 252 : index
    %c0_25 = arith.constant 0 : index
    %34 = vector.load %arg1[%c252, %c0_25] : memref<281x72xf32, #tpu.memory_space<vmem>>, vector<28x72xf32>
    %cst_26 = arith.constant dense<0.000000e+00> : vector<24x72xf32>
    %35 = tpu.matmul %30, %34, %cst_26 {dimension_numbers = #tpu.dot_dimension_numbers<[1], [0], [0], [1], [0, 0, 1, 1], [], []>} : vector<24x28xf32>, vector<28x72xf32>, vector<24x72xf32> -> vector<24x72xf32>
    %36 = arith.addf %29, %35 : vector<24x72xf32>
    %37 = arith.maximumf %33, %36 : vector<24x72xf32>
    %c280 = arith.constant 280 : index
    %c0_27 = arith.constant 0 : index
    %38 = vector.load %arg1[%c280, %c0_27] : memref<281x72xf32, #tpu.memory_space<vmem>>, vector<1x72xf32>
    %39 = vector.broadcast %38 : vector<1x72xf32> to vector<24x72xf32>
    %40 = arith.addf %37, %39 : vector<24x72xf32>
    %cst_28 = arith.constant 0.000000e+00 : f32
    %41 = vector.broadcast %cst_28 : f32 to vector<24x72xf32>
    %42 = arith.maximumf %40, %41 : vector<24x72xf32>
    %c0_29 = arith.constant 0 : index
    %c0_30 = arith.constant 0 : index
    %43 = vector.load %arg4[%c0_29, %c0_30] : memref<24x72xf32, #tpu.memory_space<vmem>>, vector<24x72xf32>
    tpu.vector_store %arg4[%c0_29, %c0_30], %42 {strides = array<i32>} : memref<24x72xf32, #tpu.memory_space<vmem>>, vector<24x72xf32>,
    %c0_31 = arith.constant 0 : index
    %c0_32 = arith.constant 0 : index
    %44 = tpu.strided_load %arg4[%c0_31, %c0_32] {strides = array<i32: 2, 1>} : memref<24x72xf32, #tpu.memory_space<vmem>>, vector<12x72xf32>
    %c1_33 = arith.constant 1 : index
    %c0_34 = arith.constant 0 : index
    %45 = tpu.strided_load %arg4[%c1_33, %c0_34] {strides = array<i32: 2, 1>} : memref<24x72xf32, #tpu.memory_space<vmem>>, vector<12x72xf32>
    %46 = arith.maximumf %44, %45 : vector<12x72xf32>
    %c0_35 = arith.constant 0 : index
    %c0_36 = arith.constant 0 : index
    %47 = vector.load %arg5[%c0_35, %c0_36] : memref<12x72xf32, #tpu.memory_space<vmem>>, vector<12x72xf32>
    tpu.vector_store %arg5[%c0_35, %c0_36], %46 {strides = array<i32>} : memref<12x72xf32, #tpu.memory_space<vmem>>, vector<12x72xf32>,
    %cst_37 = arith.constant 0.000000e+00 : f32
    %48 = vector.broadcast %cst_37 : f32 to vector<8x64xf32>
    %cst_38 = arith.constant 0.000000e+00 : f32
    %49 = vector.broadcast %cst_38 : f32 to vector<8x64xf32>
    %c0_39 = arith.constant 0 : index
    %c0_40 = arith.constant 0 : index
    %50 = vector.load %arg5[%c0_39, %c0_40] : memref<12x72xf32, #tpu.memory_space<vmem>>, vector<8x72xf32>
    %c0_41 = arith.constant 0 : index
    %c0_42 = arith.constant 0 : index
    %51 = vector.load %arg2[%c0_41, %c0_42] : memref<980x64xf32, #tpu.memory_space<vmem>>, vector<72x64xf32>
    %cst_43 = arith.constant dense<0.000000e+00> : vector<8x64xf32>
    %52 = tpu.matmul %50, %51, %cst_43 {dimension_numbers = #tpu.dot_dimension_numbers<[1], [0], [0], [1], [0, 0, 1, 1], [], []>} : vector<8x72xf32>, vector<72x64xf32>, vector<8x64xf32> -> vector<8x64xf32>
    %53 = arith.addf %48, %52 : vector<8x64xf32>
    %c360 = arith.constant 360 : index
    %c0_44 = arith.constant 0 : index
    %54 = vector.load %arg2[%c360, %c0_44] : memref<980x64xf32, #tpu.memory_space<vmem>>, vector<72x64xf32>
    %cst_45 = arith.constant dense<0.000000e+00> : vector<8x64xf32>
    %55 = tpu.matmul %50, %54, %cst_45 {dimension_numbers = #tpu.dot_dimension_numbers<[1], [0], [0], [1], [0, 0, 1, 1], [], []>} : vector<8x72xf32>, vector<72x64xf32>, vector<8x64xf32> -> vector<8x64xf32>
    %56 = arith.addf %49, %55 : vector<8x64xf32>
    %c1_46 = arith.constant 1 : index
    %c0_47 = arith.constant 0 : index
    %57 = vector.load %arg5[%c1_46, %c0_47] : memref<12x72xf32, #tpu.memory_space<vmem>>, vector<8x72xf32>
    %c72 = arith.constant 72 : index
    %c0_48 = arith.constant 0 : index
    %58 = vector.load %arg2[%c72, %c0_48] : memref<980x64xf32, #tpu.memory_space<vmem>>, vector<72x64xf32>
    %cst_49 = arith.constant dense<0.000000e+00> : vector<8x64xf32>
    %59 = tpu.matmul %57, %58, %cst_49 {dimension_numbers = #tpu.dot_dimension_numbers<[1], [0], [0], [1], [0, 0, 1, 1], [], []>} : vector<8x72xf32>, vector<72x64xf32>, vector<8x64xf32> -> vector<8x64xf32>
    %60 = arith.addf %53, %59 : vector<8x64xf32>
    %c432 = arith.constant 432 : index
    %c0_50 = arith.constant 0 : index
    %61 = vector.load %arg2[%c432, %c0_50] : memref<980x64xf32, #tpu.memory_space<vmem>>, vector<72x64xf32>
    %cst_51 = arith.constant dense<0.000000e+00> : vector<8x64xf32>
    %62 = tpu.matmul %57, %61, %cst_51 {dimension_numbers = #tpu.dot_dimension_numbers<[1], [0], [0], [1], [0, 0, 1, 1], [], []>} : vector<8x72xf32>, vector<72x64xf32>, vector<8x64xf32> -> vector<8x64xf32>
    %63 = arith.addf %56, %62 : vector<8x64xf32>
    %c2_52 = arith.constant 2 : index
    %c0_53 = arith.constant 0 : index
    %64 = vector.load %arg5[%c2_52, %c0_53] : memref<12x72xf32, #tpu.memory_space<vmem>>, vector<8x72xf32>
    %c144 = arith.constant 144 : index
    %c0_54 = arith.constant 0 : index
    %65 = vector.load %arg2[%c144, %c0_54] : memref<980x64xf32, #tpu.memory_space<vmem>>, vector<72x64xf32>
    %cst_55 = arith.constant dense<0.000000e+00> : vector<8x64xf32>
    %66 = tpu.matmul %64, %65, %cst_55 {dimension_numbers = #tpu.dot_dimension_numbers<[1], [0], [0], [1], [0, 0, 1, 1], [], []>} : vector<8x72xf32>, vector<72x64xf32>, vector<8x64xf32> -> vector<8x64xf32>
    %67 = arith.addf %60, %66 : vector<8x64xf32>
    %c504 = arith.constant 504 : index
    %c0_56 = arith.constant 0 : index
    %68 = vector.load %arg2[%c504, %c0_56] : memref<980x64xf32, #tpu.memory_space<vmem>>, vector<72x64xf32>
    %cst_57 = arith.constant dense<0.000000e+00> : vector<8x64xf32>
    %69 = tpu.matmul %64, %68, %cst_57 {dimension_numbers = #tpu.dot_dimension_numbers<[1], [0], [0], [1], [0, 0, 1, 1], [], []>} : vector<8x72xf32>, vector<72x64xf32>, vector<8x64xf32> -> vector<8x64xf32>
    %70 = arith.addf %63, %69 : vector<8x64xf32>
    %c3_58 = arith.constant 3 : index
    %c0_59 = arith.constant 0 : index
    %71 = vector.load %arg5[%c3_58, %c0_59] : memref<12x72xf32, #tpu.memory_space<vmem>>, vector<8x72xf32>
    %c216 = arith.constant 216 : index
    %c0_60 = arith.constant 0 : index
    %72 = vector.load %arg2[%c216, %c0_60] : memref<980x64xf32, #tpu.memory_space<vmem>>, vector<72x64xf32>
    %cst_61 = arith.constant dense<0.000000e+00> : vector<8x64xf32>
    %73 = tpu.matmul %71, %72, %cst_61 {dimension_numbers = #tpu.dot_dimension_numbers<[1], [0], [0], [1], [0, 0, 1, 1], [], []>} : vector<8x72xf32>, vector<72x64xf32>, vector<8x64xf32> -> vector<8x64xf32>
    %74 = arith.addf %67, %73 : vector<8x64xf32>
    %c576 = arith.constant 576 : index
    %c0_62 = arith.constant 0 : index
    %75 = vector.load %arg2[%c576, %c0_62] : memref<980x64xf32, #tpu.memory_space<vmem>>, vector<72x64xf32>
    %cst_63 = arith.constant dense<0.000000e+00> : vector<8x64xf32>
    %76 = tpu.matmul %71, %75, %cst_63 {dimension_numbers = #tpu.dot_dimension_numbers<[1], [0], [0], [1], [0, 0, 1, 1], [], []>} : vector<8x72xf32>, vector<72x64xf32>, vector<8x64xf32> -> vector<8x64xf32>
    %77 = arith.addf %70, %76 : vector<8x64xf32>
    %c4_64 = arith.constant 4 : index
    %c0_65 = arith.constant 0 : index
    %78 = vector.load %arg5[%c4_64, %c0_65] : memref<12x72xf32, #tpu.memory_space<vmem>>, vector<8x72xf32>
    %c288 = arith.constant 288 : index
    %c0_66 = arith.constant 0 : index
    %79 = vector.load %arg2[%c288, %c0_66] : memref<980x64xf32, #tpu.memory_space<vmem>>, vector<72x64xf32>
    %cst_67 = arith.constant dense<0.000000e+00> : vector<8x64xf32>
    %80 = tpu.matmul %78, %79, %cst_67 {dimension_numbers = #tpu.dot_dimension_numbers<[1], [0], [0], [1], [0, 0, 1, 1], [], []>} : vector<8x72xf32>, vector<72x64xf32>, vector<8x64xf32> -> vector<8x64xf32>
    %81 = arith.addf %74, %80 : vector<8x64xf32>
    %c648 = arith.constant 648 : index
    %c0_68 = arith.constant 0 : index
    %82 = vector.load %arg2[%c648, %c0_68] : memref<980x64xf32, #tpu.memory_space<vmem>>, vector<72x64xf32>
    %cst_69 = arith.constant dense<0.000000e+00> : vector<8x64xf32>
    %83 = tpu.matmul %78, %82, %cst_69 {dimension_numbers = #tpu.dot_dimension_numbers<[1], [0], [0], [1], [0, 0, 1, 1], [], []>} : vector<8x72xf32>, vector<72x64xf32>, vector<8x64xf32> -> vector<8x64xf32>
    %84 = arith.addf %77, %83 : vector<8x64xf32>
    %85 = arith.maximumf %81, %84 : vector<8x64xf32>
    %c720 = arith.constant 720 : index
    %c0_70 = arith.constant 0 : index
    %86 = vector.load %arg2[%c720, %c0_70] : memref<980x64xf32, #tpu.memory_space<vmem>>, vector<1x64xf32>
    %87 = vector.broadcast %86 : vector<1x64xf32> to vector<8x64xf32>
    %88 = arith.addf %85, %87 : vector<8x64xf32>
    %cst_71 = arith.constant 0.000000e+00 : f32
    %89 = vector.broadcast %cst_71 : f32 to vector<8x64xf32>
    %90 = arith.maximumf %88, %89 : vector<8x64xf32>
    %c0_72 = arith.constant 0 : index
    %c0_73 = arith.constant 0 : index
    %91 = vector.load %arg6[%c0_72, %c0_73] : memref<8x64xf32, #tpu.memory_space<vmem>>, vector<8x64xf32>
    tpu.vector_store %arg6[%c0_72, %c0_73], %90 {strides = array<i32>} : memref<8x64xf32, #tpu.memory_space<vmem>>, vector<8x64xf32>,
    %c0_74 = arith.constant 0 : index
    %c0_75 = arith.constant 0 : index
    %92 = tpu.strided_load %arg6[%c0_74, %c0_75] {strides = array<i32: 2, 1>} : memref<8x64xf32, #tpu.memory_space<vmem>>, vector<4x64xf32>
    %c1_76 = arith.constant 1 : index
    %c0_77 = arith.constant 0 : index
    %93 = tpu.strided_load %arg6[%c1_76, %c0_77] {strides = array<i32: 2, 1>} : memref<8x64xf32, #tpu.memory_space<vmem>>, vector<4x64xf32>
    %94 = arith.maximumf %92, %93 : vector<4x64xf32>
    %95 = vector.extract_strided_slice %94 {offsets = [0, 0], sizes = [1, 64], strides = [1, 1]} : vector<4x64xf32> to vector<1x64xf32>
    %c0_78 = arith.constant 0 : index
    %c0_79 = arith.constant 0 : index
    %96 = vector.load %arg7[%c0_78, %c0_79] : memref<1x256xf32, #tpu.memory_space<vmem>>, vector<1x64xf32>
    tpu.vector_store %arg7[%c0_78, %c0_79], %95 {strides = array<i32>} : memref<1x256xf32, #tpu.memory_space<vmem>>, vector<1x64xf32>,
    %97 = vector.extract_strided_slice %94 {offsets = [1, 0], sizes = [1, 64], strides = [1, 1]} : vector<4x64xf32> to vector<1x64xf32>
    %c0_80 = arith.constant 0 : index
    %c64 = arith.constant 64 : index
    %98 = vector.load %arg7[%c0_80, %c64] : memref<1x256xf32, #tpu.memory_space<vmem>>, vector<1x64xf32>
    tpu.vector_store %arg7[%c0_80, %c64], %97 {strides = array<i32>} : memref<1x256xf32, #tpu.memory_space<vmem>>, vector<1x64xf32>,
    %99 = vector.extract_strided_slice %94 {offsets = [2, 0], sizes = [1, 64], strides = [1, 1]} : vector<4x64xf32> to vector<1x64xf32>
    %c0_81 = arith.constant 0 : index
    %c128 = arith.constant 128 : index
    %100 = vector.load %arg7[%c0_81, %c128] : memref<1x256xf32, #tpu.memory_space<vmem>>, vector<1x64xf32>
    tpu.vector_store %arg7[%c0_81, %c128], %99 {strides = array<i32>} : memref<1x256xf32, #tpu.memory_space<vmem>>, vector<1x64xf32>,
    %101 = vector.extract_strided_slice %94 {offsets = [3, 0], sizes = [1, 64], strides = [1, 1]} : vector<4x64xf32> to vector<1x64xf32>
    %c0_82 = arith.constant 0 : index
    %c192 = arith.constant 192 : index
    %102 = vector.load %arg7[%c0_82, %c192] : memref<1x256xf32, #tpu.memory_space<vmem>>, vector<1x64xf32>
    tpu.vector_store %arg7[%c0_82, %c192], %101 {strides = array<i32>} : memref<1x256xf32, #tpu.memory_space<vmem>>, vector<1x64xf32>,
    %c0_83 = arith.constant 0 : index
    %c0_84 = arith.constant 0 : index
    %103 = vector.load %arg7[%c0_83, %c0_84] : memref<1x256xf32, #tpu.memory_space<vmem>>, vector<1x256xf32>
    %c721 = arith.constant 721 : index
    %c0_85 = arith.constant 0 : index
    %104 = vector.load %arg2[%c721, %c0_85] : memref<980x64xf32, #tpu.memory_space<vmem>>, vector<256x64xf32>
    %cst_86 = arith.constant dense<0.000000e+00> : vector<1x64xf32>
    %105 = tpu.matmul %103, %104, %cst_86 {dimension_numbers = #tpu.dot_dimension_numbers<[1], [0], [0], [1], [0, 0, 1, 1], [], []>} : vector<1x256xf32>, vector<256x64xf32>, vector<1x64xf32> -> vector<1x64xf32>
    %c977 = arith.constant 977 : index
    %c0_87 = arith.constant 0 : index
    %106 = vector.load %arg2[%c977, %c0_87] : memref<980x64xf32, #tpu.memory_space<vmem>>, vector<1x64xf32>
    %107 = arith.addf %105, %106 : vector<1x64xf32>
    %cst_88 = arith.constant 0.000000e+00 : f32
    %108 = vector.broadcast %cst_88 : f32 to vector<1x64xf32>
    %109 = arith.maximumf %107, %108 : vector<1x64xf32>
    %c978 = arith.constant 978 : index
    %c0_89 = arith.constant 0 : index
    %110 = vector.load %arg2[%c978, %c0_89] : memref<980x64xf32, #tpu.memory_space<vmem>>, vector<1x64xf32>
    %111 = arith.mulf %109, %110 : vector<1x64xf32>
    %cst_90 = arith.constant dense<0.000000e+00> : vector<1xf32>
    %112 = vector.multi_reduction <add>, %111, %cst_90 [1] : vector<1x64xf32> to vector<1xf32>
    %113 = vector.shape_cast %112 : vector<1xf32> to vector<1x1xf32>
    %c979 = arith.constant 979 : index
    %c0_91 = arith.constant 0 : index
    %114 = vector.load %arg2[%c979, %c0_91] : memref<980x64xf32, #tpu.memory_space<vmem>>, vector<1x1xf32>
    %115 = arith.addf %113, %114 : vector<1x1xf32>
    %cst_92 = arith.constant 0.318309873 : f32
    %116 = vector.broadcast %cst_92 : f32 to vector<1x1xf32>
    %117 = arith.mulf %115, %116 : vector<1x1xf32>
    %cst_93 = arith.constant 5.000000e-01 : f32
    %118 = vector.broadcast %cst_93 : f32 to vector<1x1xf32>
    %119 = arith.addf %117, %118 : vector<1x1xf32>
    %120 = math.floor %119 : vector<1x1xf32>
    %cst_94 = arith.constant 3.14159274 : f32
    %121 = vector.broadcast %cst_94 : f32 to vector<1x1xf32>
    %122 = arith.mulf %120, %121 : vector<1x1xf32>
    %123 = arith.subf %115, %122 : vector<1x1xf32>
    %cst_95 = arith.constant 5.000000e-01 : f32
    %124 = vector.broadcast %cst_95 : f32 to vector<1x1xf32>
    %125 = arith.mulf %124, %120 : vector<1x1xf32>
    %cst_96 = arith.constant 5.000000e-01 : f32
    %126 = vector.broadcast %cst_96 : f32 to vector<1x1xf32>
    %127 = arith.mulf %126, %120 : vector<1x1xf32>
    %128 = math.floor %127 : vector<1x1xf32>
    %129 = arith.subf %125, %128 : vector<1x1xf32>
    %cst_97 = arith.constant 4.000000e+00 : f32
    %130 = vector.broadcast %cst_97 : f32 to vector<1x1xf32>
    %131 = arith.mulf %130, %129 : vector<1x1xf32>
    %cst_98 = arith.constant 1.000000e+00 : f32
    %132 = vector.broadcast %cst_98 : f32 to vector<1x1xf32>
    %133 = arith.subf %132, %131 : vector<1x1xf32>
    %134 = arith.mulf %123, %123 : vector<1x1xf32>
    %cst_99 = arith.constant -2.50521079E-8 : f32
    %135 = vector.broadcast %cst_99 : f32 to vector<1x1xf32>
    %136 = arith.mulf %134, %135 : vector<1x1xf32>
    %cst_100 = arith.constant 2.75573188E-6 : f32
    %137 = vector.broadcast %cst_100 : f32 to vector<1x1xf32>
    %138 = arith.addf %137, %136 : vector<1x1xf32>
    %139 = arith.mulf %134, %138 : vector<1x1xf32>
    %cst_101 = arith.constant -1.98412701E-4 : f32
    %140 = vector.broadcast %cst_101 : f32 to vector<1x1xf32>
    %141 = arith.addf %140, %139 : vector<1x1xf32>
    %142 = arith.mulf %134, %141 : vector<1x1xf32>
    %cst_102 = arith.constant 0.00833333377 : f32
    %143 = vector.broadcast %cst_102 : f32 to vector<1x1xf32>
    %144 = arith.addf %143, %142 : vector<1x1xf32>
    %145 = arith.mulf %134, %144 : vector<1x1xf32>
    %cst_103 = arith.constant -0.166666672 : f32
    %146 = vector.broadcast %cst_103 : f32 to vector<1x1xf32>
    %147 = arith.addf %146, %145 : vector<1x1xf32>
    %148 = arith.mulf %134, %147 : vector<1x1xf32>
    %cst_104 = arith.constant 1.000000e+00 : f32
    %149 = vector.broadcast %cst_104 : f32 to vector<1x1xf32>
    %150 = arith.addf %149, %148 : vector<1x1xf32>
    %151 = arith.mulf %123, %150 : vector<1x1xf32>
    %152 = arith.mulf %133, %151 : vector<1x1xf32>
    %cst_105 = arith.constant 1.000000e+00 : f32
    %153 = vector.broadcast %cst_105 : f32 to vector<1x1xf32>
    %154 = arith.addf %153, %152 : vector<1x1xf32>
    %cst_106 = arith.constant 5.000000e-01 : f32
    %155 = vector.broadcast %cst_106 : f32 to vector<1x1xf32>
    %156 = arith.mulf %155, %154 : vector<1x1xf32>
    %157 = tpu.iota {dimensions = array<i32: 1>} : vector<1x2xi32>
    %158 = arith.sitofp %157 : vector<1x2xi32> to vector<1x2xf32>
    %cst_107 = arith.constant 1.000000e+00 : f32
    %159 = vector.broadcast %cst_107 : f32 to vector<1x2xf32>
    %160 = arith.subf %159, %158 : vector<1x2xf32>
    %161 = vector.broadcast %156 : vector<1x1xf32> to vector<1x2xf32>
    %162 = arith.mulf %161, %160 : vector<1x2xf32>
    %cst_108 = arith.constant 1.000000e+00 : f32
    %163 = vector.broadcast %cst_108 : f32 to vector<1x1xf32>
    %164 = arith.subf %163, %156 : vector<1x1xf32>
    %165 = vector.broadcast %164 : vector<1x1xf32> to vector<1x2xf32>
    %166 = arith.mulf %165, %158 : vector<1x2xf32>
    %167 = arith.addf %162, %166 : vector<1x2xf32>
    %c0_109 = arith.constant 0 : index
    %c0_110 = arith.constant 0 : index
    %168 = vector.load %arg3[%c0_109, %c0_110] : memref<1x2xf32, #tpu.memory_space<vmem>>, vector<1x2xf32>
    tpu.vector_store %arg3[%c0_109, %c0_110], %167 {strides = array<i32>} : memref<1x2xf32, #tpu.memory_space<vmem>>, vector<1x2xf32>,
    return
  }
}

</mosaic_0001>

<bundles_post_ra>
// kernel: net_forward.1
= control target key start
LH: loop header
LB: loop body
LE: loop exit
PB: predicated region body
PF: predicated region fallthrough
CT: control target
= control target key end

     0   :  { %vm43_vm0 = vcmask 1043456   ;;  %vm33_vm1 = vcmask 228352   ;;  %s1755_s0 = inlined_call_operand.vmem [shape: f32[28,28], index: 0, kind: input, shape index: {}]   ;;  %s1756_s1 = inlined_call_operand.vmem [shape: f32[281,72], index: 1, kind: input, shape index: {}]   ;;  %s1757_s2 = inlined_call_operand.vmem [shape: f32[980,64], index: 2, kind: input, shape index: {}]   ;;  %s1758_s3 = inlined_call_operand.hbm [shape: f32[1,2], index: 3, kind: output, shape index: {}]  }
   0x1   :  { %v32_v0 = vld [vmem:[%s1756_s1 + $0x34] sm:$0xf]  ;;  %v21_v1 = vld [vmem:[%s1756_s1 + $0x18] sm:$0xf]  ;;  %v31_v2 = vld [vmem:[%s1756_s1 + $0x2c] sm:$0xff] }
   0x2   :  { %956 = vmatpush.msk.msra.mxu0 %vm43_vm0, %v32_v0  ;;  %960 = vmatpush.msk.msra.mxu1 %vm43_vm0, %v21_v1  ;;  %v20_v3 = vld [vmem:[%s1756_s1 + $0x10] sm:$0xff]  ;;  %v30_v4 = vld [vmem:[%s1756_s1 + $0x24] sm:$0xff]  ;;  %v114_v6 = vld [vmem:[%s1756_s1 + $0xc0] sm:$0xf] }
   0x3   :  { %v19_v5 = vld [vmem:[%s1756_s1 + $0x8] sm:$0xff]  ;;  %v25_v7 = vld [vmem:[%s1756_s1 + $0xa4] sm:$0xf]  ;;  %v29_v8 = vld [vmem:[%s1756_s1 + $0x1c] sm:$0xff]  ;;  %1006 = vmatpush.msk.msra.mxu2 %vm43_vm0, %v114_v6 }
   0x4   :  { %60 = vmatpush.msra.mxu0 %v31_v2  ;;  %98 = vmatpush.msra.mxu1 %v20_v3  ;;  %v18_v9 = vld [vmem:[%s1756_s1] sm:$0xff]  ;;  %v113_v12 = vld [vmem:[%s1756_s1 + $0xb8] sm:$0xff]  ;;  %v112_v14 = vld [vmem:[%s1756_s1 + $0xb0] sm:$0xff] }
   0x5   :  { %v1106_v10 = vld [vmem:[%s1755_s0 + $0x1] sm:$0xff]  ;;  %1010 = vmatpush.msk.msra.mxu3 %vm43_vm0, %v25_v7  ;;  %1007 = vmatpush.msra.mxu2 %v113_v12  ;;  %v23_v15 = vld [vmem:[%s1756_s1 + $0x94] sm:$0xff]  ;;  %v22_v17 = vld [vmem:[%s1756_s1 + $0x8c] sm:$0xff] }
   0x6   :  { %61 = vmatpush.msra.mxu0 %v30_v4  ;;  %99 = vmatpush.msra.mxu1 %v19_v5  ;;  %v1113_v11 = vld [vmem:[%s1755_s0] sm:$0xff]  ;;  %v111_v16 = vld [vmem:[%s1756_s1 + $0xa8] sm:$0xff]  ;;  %v28_v20 = vld [vmem:[%s1755_s0 + $0x11] sm:$0xff] }
   0x7   :  { %v24_v13 = vld [vmem:[%s1756_s1 + $0x9c] sm:$0xff]  ;;  %1008 = vmatpush.msra.mxu2 %v112_v14  ;;  %v1142_v18 = vld [vmem:[%s1755_s0 + $0x9] sm:$0xff] }
   0x8   :  { %1011 = vmatpush.msra.mxu3 %v24_v13  ;;  %62 = vmatpush.msra.mxu0 %v29_v8  ;;  %v1147_v19 = vld [vmem:[%s1755_s0 + $0x8] sm:$0xff]  ;;  %v17_v21 = vld [vmem:[%s1755_s0 + $0x10] sm:$0xff]  ;;  %v224_v23 = vld [vmem:[%s1756_s1 + $0xdc] sm:$0xf] }
   0x9   :  { %100 = vmatpush.msra.mxu1 %v18_v9  ;;  %957 = vmatmul.msk.f32.vlgmr.msra.gmra.mxu0 %vm33_vm1, %v1106_v10  ;;  %v179_v22 = vld [vmem:[%s1756_s1 + $0x50] sm:$0xf] }
   0xa   :  { %961 = vmatmul.msk.f32.vlgmr.msra.gmra.mxu1 %vm33_vm1, %v1113_v11  ;;  %964 = vmatpush.msk.msrb.mxu0 %vm43_vm0, %v114_v6 }
   0xb   :  { %968 = vmatpush.msk.msrb.mxu1 %vm43_vm0, %v25_v7  ;;  %1012 = vmatpush.msra.mxu3 %v23_v15 }
   0xc   :  { %131 = vmatpush.msrb.mxu0 %v113_v12  ;;  %1009 = vmatpush.msra.mxu2 %v111_v16 }
   0xd   :  { %160 = vmatpush.msrb.mxu1 %v24_v13  ;;  %1013 = vmatpush.msra.mxu3 %v22_v17 }
   0xe   :  { %132 = vmatpush.msrb.mxu0 %v112_v14  ;;  %967 = vmatmul.msk.f32.vlgmr.msra.gmra.mxu2 %vm33_vm1, %v28_v20 }
   0xf   :  { %161 = vmatpush.msrb.mxu1 %v23_v15  ;;  %971 = vmatmul.msk.f32.vlgmr.msra.gmra.mxu3 %vm33_vm1, %v17_v21 }
  0x10   :  { %8 = vsyncpa [#allocation7], 0  ;;  %133 = vmatpush.msrb.mxu0 %v111_v16  ;;  %v263_v24 = vld [vmem:[%s1756_s1 + $0x6c] sm:$0xf]  ;;  %v308_v25 = vld [vmem:[%s1756_s1 + $0xf8] sm:$0xf] }
  0x11   :  { %162 = vmatpush.msrb.mxu1 %v22_v17  ;;  %958 = vmatmul.msk.f32.gmra.mxu0 %vm33_vm1, %v1142_v18  ;;  %v178_v26 = vld [vmem:[%s1756_s1 + $0x48] sm:$0xff]  ;;  %v223_v27 = vld [vmem:[%s1756_s1 + $0xd4] sm:$0xff]  ;;  %v177_v30 = vld [vmem:[%s1756_s1 + $0x40] sm:$0xff]  ;;  %vm436_vm2 = vcmask 588800   ;;  %vm450_vm3 = vcmask 584704   ;;  %vm773_vm4 = vcmask 523264  }
  0x12   :  { %962 = vmatmul.msk.f32.gmra.mxu1 %vm33_vm1, %v1147_v19  ;;  %972 = vmatpush.msk.msra.mxu0 %vm43_vm0, %v179_v22  ;;  %v262_v28 = vld [vmem:[%s1756_s1 + $0x64] sm:$0xff]  ;;  %v307_v29 = vld [vmem:[%s1756_s1 + $0xf0] sm:$0xff]  ;;  %v261_v32 = vld [vmem:[%s1756_s1 + $0x5c] sm:$0xff]  ;;  %s1048_s10 = smov 64   ;;  %vm889_vm9 = vcmask 516096   ;;  %vm938_vm10 = vcmask 8192  }
  0x13   :  { %976 = vmatpush.msk.msra.mxu1 %vm43_vm0, %v224_v23  ;;  %980 = vmatpush.msk.msrb.mxu2 %vm43_vm0, %v263_v24  ;;  %v222_v31 = vld [vmem:[%s1756_s1 + $0xcc] sm:$0xff]  ;;  %v176_v34 = vld [vmem:[%s1756_s1 + $0x38] sm:$0xff]  ;;  %v221_v35 = vld [vmem:[%s1756_s1 + $0xc4] sm:$0xff] }
  0x14   :  { %984 = vmatpush.msk.msrb.mxu3 %vm43_vm0, %v308_v25  ;;  %205 = vmatpush.msra.mxu0 %v178_v26  ;;  %v306_v33 = vld [vmem:[%s1756_s1 + $0xe8] sm:$0xff]  ;;  %v260_v36 = vld [vmem:[%s1756_s1 + $0x54] sm:$0xff]  ;;  %v305_v37 = vld [vmem:[%s1756_s1 + $0xe0] sm:$0xff] }
  0x15   :  { %241 = vmatpush.msra.mxu1 %v223_v27  ;;  %289 = vmatpush.msrb.mxu2 %v262_v28  ;;  %v257_v38 = vld [vmem:[%s1755_s0 + $0x3] sm:$0xff]  ;;  %v392_v40 = vld [vmem:[%s1756_s1 + $0x114] sm:$0xf]  ;;  %v258_v41 = vld [vmem:[%s1755_s0 + $0xb] sm:$0xff] }
  0x16   :  { %325 = vmatpush.msrb.mxu3 %v307_v29  ;;  %206 = vmatpush.msra.mxu0 %v177_v30  ;;  %v347_v39 = vld [vmem:[%s1756_s1 + $0x88] sm:$0xf]  ;;  %v346_v42 = vld [vmem:[%s1756_s1 + $0x80] sm:$0xff]  ;;  %v391_v43 = vld [vmem:[%s1756_s1 + $0x10c] sm:$0xff] }
  0x17   :  { %242 = vmatpush.msra.mxu1 %v222_v31  ;;  %290 = vmatpush.msrb.mxu2 %v261_v32  ;;  %v345_v44 = vld [vmem:[%s1756_s1 + $0x78] sm:$0xff]  ;;  %v390_v45 = vld [vmem:[%s1756_s1 + $0x104] sm:$0xff]  ;;  %v344_v46 = vld [vmem:[%s1756_s1 + $0x70] sm:$0xff] }
  0x18   :  { %326 = vmatpush.msrb.mxu3 %v306_v33  ;;  %207 = vmatpush.msra.mxu0 %v176_v34  ;;  %v389_v47 = vld [vmem:[%s1756_s1 + $0xfc] sm:$0xff]  ;;  %v259_v48 = vld [vmem:[%s1755_s0 + $0x13] sm:$0xff]  ;;  %v174_v50 = vld [vmem:[%s1755_s0 + $0xa] sm:$0xff] }
  0x19   :  { %243 = vmatpush.msra.mxu1 %v221_v35  ;;  %959 = vmatmul.msk.f32.gmra.mxu0 %vm33_vm1, %v28_v20  ;;  %v173_v49 = vld [vmem:[%s1755_s0 + $0x2] sm:$0xff]  ;;  %v175_v51 = vld [vmem:[%s1755_s0 + $0x12] sm:$0xff] }
  0x1a   :  { %963 = vmatmul.msk.f32.gmra.mxu1 %vm33_vm1, %v17_v21  ;;  %291 = vmatpush.msrb.mxu2 %v260_v36  ;;  %v341_v52 = vld [vmem:[%s1755_s0 + $0x4] sm:$0xff]  ;;  %v342_v53 = vld [vmem:[%s1755_s0 + $0xc] sm:$0xff]  ;;  %v343_v54 = vld [vmem:[%s1755_s0 + $0x14] sm:$0xff]  ;;  %s947_s0 = sshll.u32 %s1758_s3, 4  ;;  %s948_s0 = int_to_ptr.hbm [resolvable:$true] %s947_s0 }
  0x1b   :  { %327 = vmatpush.msrb.mxu3 %v305_v37  ;;  %981 = vmatmul.msk.f32.vlgmr.msrb.gmra.mxu2 %vm33_vm1, %v257_v38  ;;  %v461_v1 = vld [vmem:[%s1757_s2 + $0x40] sm:$0xff]  ;;  %v460_v2 = vld [vmem:[%s1757_s2 + $0x38] sm:$0xff]  ;;  %v459_v3 = vld [vmem:[%s1757_s2 + $0x30] sm:$0xff] }
  0x1c   :  { %985 = vmatmul.msk.f32.vlgmr.msrb.gmra.mxu3 %vm33_vm1, %v257_v38  ;;  %v458_v4 = vld [vmem:[%s1757_s2 + $0x28] sm:$0xff]  ;;  %v457_v8 = vld [vmem:[%s1757_s2 + $0x20] sm:$0xff]  ;;  %v455_v12 = vld [vmem:[%s1757_s2 + $0x10] sm:$0xff] }
  0x1d   :  { %514 = vmatpush.msra.mxu3 %v461_v1  ;;  %v480_v7 = vld [vmem:[%s1757_s2 + $0x88] sm:$0xff]  ;;  %v479_v9 = vld [vmem:[%s1757_s2 + $0x80] sm:$0xff]  ;;  %v477_v15 = vld [vmem:[%s1757_s2 + $0x70] sm:$0xff] }
  0x1e   :  { %491 = vmatpush.msra.mxu2 %v480_v7  ;;  %v454_v16 = vld [vmem:[%s1757_s2 + $0x8] sm:$0xff]  ;;  %v453_v20 = vld [vmem:[%s1757_s2] sm:$0xff]  ;;  %v585_v21 = vld [vmem:[%s1757_s2 + $0xd0] sm:$0xff] }
  0x1f   :  { %515 = vmatpush.msra.mxu3 %v460_v2  ;;  %v618_v22 = vld [vmem:[%s1757_s2 + $0x238] sm:$0xff]  ;;  %v470_v23 = vld [vmem:[%s1757_s2 + $0x1a8] sm:$0xff]  ;;  %v475_v24 = vld [vmem:[%s1757_s2 + $0x60] sm:$0xff] }
  0x20   :  { %492 = vmatpush.msra.mxu2 %v479_v9  ;;  %v584_v25 = vld [vmem:[%s1757_s2 + $0xc8] sm:$0xff]  ;;  %v617_v26 = vld [vmem:[%s1757_s2 + $0x230] sm:$0xff]  ;;  %v469_v27 = vld [vmem:[%s1757_s2 + $0x1a0] sm:$0xff] }
  0x21   :  { %965 = vmatmul.msk.f32.vlgmr.msrb.gmra.mxu0 %vm33_vm1, %v1106_v10  ;;  %516 = vmatpush.msra.mxu3 %v459_v3  ;;  %v456_v10 = vld [vmem:[%s1757_s2 + $0x18] sm:$0xff]  ;;  %v583_v29 = vld [vmem:[%s1757_s2 + $0xc0] sm:$0xff]  ;;  %v616_v30 = vld [vmem:[%s1757_s2 + $0x228] sm:$0xff] }
  0x22   :  { %969 = vmatmul.msk.f32.vlgmr.msrb.gmra.mxu1 %vm33_vm1, %v1113_v11  ;;  %988 = vmatpush.msk.msrb.mxu0 %vm43_vm0, %v347_v39  ;;  %v478_v11 = vld [vmem:[%s1757_s2 + $0x78] sm:$0xff]  ;;  %v473_v32 = vld [vmem:[%s1757_s2 + $0x50] sm:$0xff]  ;;  %v615_v34 = vld [vmem:[%s1757_s2 + $0x220] sm:$0xff] }
  0x23   :  { %992 = vmatpush.msk.msrb.mxu1 %vm43_vm0, %v392_v40  ;;  %982 = vmatmul.msk.f32.gmra.mxu2 %vm33_vm1, %v258_v41  ;;  %v474_v28 = vld [vmem:[%s1757_s2 + $0x58] sm:$0xff]  ;;  %v467_v37 = vld [vmem:[%s1757_s2 + $0x190] sm:$0xff]  ;;  %v472_v40 = vld [vmem:[%s1757_s2 + $0x48] sm:$0xff] }
  0x24   :  { %986 = vmatmul.msk.f32.gmra.mxu3 %vm33_vm1, %v258_v41  ;;  %373 = vmatpush.msrb.mxu0 %v346_v42  ;;  %v468_v31 = vld [vmem:[%s1757_s2 + $0x198] sm:$0xff]  ;;  %v581_v41 = vld [vmem:[%s1757_s2 + $0xb0] sm:$0xff] }
  0x25   :  { %409 = vmatpush.msrb.mxu1 %v391_v43  ;;  %517 = vmatpush.msra.mxu3 %v458_v4  ;;  %v582_v33 = vld [vmem:[%s1757_s2 + $0xb8] sm:$0xff]  ;;  %v577_v9 = vld [vmem:[%s1757_s2 + $0x90] sm:$0xff] }
  0x26   :  { %374 = vmatpush.msrb.mxu0 %v345_v44  ;;  %493 = vmatpush.msra.mxu2 %v478_v11  ;;  %v614_v42 = vld [vmem:[%s1757_s2 + $0x218] sm:$0xff]  ;;  %v531_v11 = vld [vmem:[%s1757_s2 + $0x1d0] sm:$0xff] }
  0x27   :  { %410 = vmatpush.msrb.mxu1 %v390_v45  ;;  %518 = vmatpush.msra.mxu3 %v457_v8  ;;  %v535_v45 = vld [vmem:[%s1757_s2 + $0x1f0] sm:$0xff]  ;;  %v1471_v3 = vld [vmem:[%s1756_s1 + $0x118] ss:$0 sm:$0xff] }
  0x28   :  { %375 = vmatpush.msrb.mxu0 %v344_v46  ;;  %494 = vmatpush.msra.mxu2 %v477_v15  ;;  %v466_v46 = vld [vmem:[%s1757_s2 + $0x188] sm:$0xff]  ;;  %v532_v4 = vld [vmem:[%s1757_s2 + $0x1d8] sm:$0xff] }
  0x29   :  { %411 = vmatpush.msrb.mxu1 %v389_v47  ;;  %966 = vmatmul.msk.f32.gmra.mxu0 %vm33_vm1, %v1142_v18  ;;  %v580_v47 = vld [vmem:[%s1757_s2 + $0xa8] sm:$0xff] }
  0x2a   :  { %970 = vmatmul.msk.f32.gmra.mxu1 %vm33_vm1, %v1147_v19  ;;  %519 = vmatpush.msra.mxu3 %v456_v10  ;;  %v476_v19 = vld [vmem:[%s1757_s2 + $0x68] sm:$0xff]  ;;  %v610_v10 = vld [vmem:[%s1757_s2 + $0x1f8] sm:$0xff] }
  0x2b   :  { %983 = vmatmul.msk.f32.gmra.mxu2 %vm33_vm1, %v259_v48  ;;  %v462_v15 = vld [vmem:[%s1757_s2 + $0x168] sm:$0xff] }
  0x2c   :  { %987 = vmatmul.msk.f32.gmra.mxu3 %vm33_vm1, %v259_v48  ;;  %495 = vmatpush.msra.mxu2 %v476_v19  ;;  %v613_v48 = vld [vmem:[%s1757_s2 + $0x210] sm:$0xff]  ;;  %v746_v19 = vld [vmem:[%s1757_s2 + $0x2c8] sm:$0xff] }
  0x2d   :  { %520 = vmatpush.msra.mxu3 %v455_v12 }
  0x2e   :  { %496 = vmatpush.msra.mxu2 %v475_v24  ;;  %v712_v24 = vld [vmem:[%s1757_s2 + $0x158] sm:$0xff] }
  0x2f   :  { %521 = vmatpush.msra.mxu3 %v454_v16  ;;  %v713_v16 = vld [vmem:[%s1757_s2 + $0x160] sm:$0xff] }
  0x30   :  { %497 = vmatpush.msra.mxu2 %v474_v28 }
  0x31   :  { %973 = vmatmul.msk.f32.vlgmr.msra.gmra.mxu0 %vm33_vm1, %v173_v49  ;;  %522 = vmatpush.msra.mxu3 %v453_v20 }
  0x32   :  { %977 = vmatmul.msk.f32.vlgmr.msra.gmra.mxu1 %vm33_vm1, %v173_v49  ;;  %596 = vmatpush.msra.mxu0 %v585_v21 }
  0x33   :  { %626 = vmatpush.msra.mxu1 %v618_v22  ;;  %563 = vmatpush.msrb.mxu3 %v470_v23  ;;  %v530_v23 = vld [vmem:[%s1757_s2 + $0x1c8] sm:$0xff] }
  0x34   :  { %597 = vmatpush.msra.mxu0 %v584_v25  ;;  %498 = vmatpush.msra.mxu2 %v473_v32  ;;  %v745_v25 = vld [vmem:[%s1757_s2 + $0x2c0] sm:$0xff] }
  0x35   :  { %627 = vmatpush.msra.mxu1 %v617_v26  ;;  %564 = vmatpush.msrb.mxu3 %v469_v27  ;;  %v711_v26 = vld [vmem:[%s1757_s2 + $0x150] sm:$0xff]  ;;  %v744_v27 = vld [vmem:[%s1757_s2 + $0x2b8] sm:$0xff] }
  0x36   :  { %598 = vmatpush.msra.mxu0 %v583_v29  ;;  %499 = vmatpush.msra.mxu2 %v472_v40  ;;  %v527_v40 = vld [vmem:[%s1757_s2 + $0x1b0] sm:$0xff] }
  0x37   :  { %628 = vmatpush.msra.mxu1 %v616_v30  ;;  %565 = vmatpush.msrb.mxu3 %v468_v31 }
  0x38   :  { %599 = vmatpush.msra.mxu0 %v582_v33  ;;  %543 = vmatpush.msrb.mxu2 %v535_v45 }
  0x39   :  { %974 = vmatmul.msk.f32.gmra.mxu0 %vm33_vm1, %v174_v50  ;;  %629 = vmatpush.msra.mxu1 %v615_v34  ;;  %v528_v34 = vld [vmem:[%s1757_s2 + $0x1b8] sm:$0xff] }
  0x3a   :  { %978 = vmatmul.msk.f32.gmra.mxu1 %vm33_vm1, %v174_v50  ;;  %566 = vmatpush.msrb.mxu3 %v467_v37 }
  0x3b   :  { %600 = vmatpush.msra.mxu0 %v581_v41  ;;  %630 = vmatpush.msra.mxu1 %v614_v42  ;;  %v709_v41 = vld [vmem:[%s1757_s2 + $0x140] sm:$0xff]  ;;  %v742_v42 = vld [vmem:[%s1757_s2 + $0x2a8] sm:$0xff] }
  0x3c   :  { %567 = vmatpush.msrb.mxu3 %v466_v46 }
  0x3d   :  { %601 = vmatpush.msra.mxu0 %v580_v47  ;;  %631 = vmatpush.msra.mxu1 %v613_v48  ;;  %v708_v47 = vld [vmem:[%s1757_s2 + $0x138] sm:$0xff]  ;;  %v741_v48 = vld [vmem:[%s1757_s2 + $0x2a0] sm:$0xff] }
  0x41   :  { %975 = vmatmul.msk.f32.gmra.mxu0 %vm33_vm1, %v175_v51 }
  0x42   :  { %979 = vmatmul.msk.f32.gmra.mxu1 %vm33_vm1, %v175_v51  ;;  %v534_v51 = vld [vmem:[%s1757_s2 + $0x1e8] sm:$0xff] }
  0x43   :  { %544 = vmatpush.msrb.mxu2 %v534_v51  ;;  %v740_v51 = vld [vmem:[%s1757_s2 + $0x298] sm:$0xff] }
  0x49   :  { %989 = vmatmul.msk.f32.vlgmr.msrb.gmra.mxu0 %vm33_vm1, %v341_v52 }
  0x4a   :  { %993 = vmatmul.msk.f32.vlgmr.msrb.gmra.mxu1 %vm33_vm1, %v341_v52  ;;  %v465_v52 = vld [vmem:[%s1757_s2 + $0x180] sm:$0xff] }
  0x4b   :  { %568 = vmatpush.msrb.mxu3 %v465_v52 }
  0x51   :  { %990 = vmatmul.msk.f32.gmra.mxu0 %vm33_vm1, %v342_v53 }
  0x52   :  { %994 = vmatmul.msk.f32.gmra.mxu1 %vm33_vm1, %v342_v53  ;;  %v579_v53 = vld [vmem:[%s1757_s2 + $0xa0] sm:$0xff] }
  0x53   :  { %602 = vmatpush.msra.mxu0 %v579_v53 }
  0x59   :  { %991 = vmatmul.msk.f32.gmra.mxu0 %vm33_vm1, %v343_v54 }
  0x5a   :  { %995 = vmatmul.msk.f32.gmra.mxu1 %vm33_vm1, %v343_v54  ;;  %v612_v54 = vld [vmem:[%s1757_s2 + $0x208] sm:$0xff] }
  0x5b   :  { %632 = vmatpush.msra.mxu1 %v612_v54 }
  0x86   :  { %v1294_v55 = vpop.f32.mrf.mxu0 }
  0x87   :  { %v1296_v56 = vpop.f32.mrf.mxu1 }
  0x88   :  { %v103_v43 = vadd.f32 %v1296_v56, %v1294_v55  ;;  %v533_v55 = vld [vmem:[%s1757_s2 + $0x1e0] sm:$0xff]  ;;  %v464_v56 = vld [vmem:[%s1757_s2 + $0x178] sm:$0xff] }
  0x89   :  { %545 = vmatpush.msrb.mxu2 %v533_v55  ;;  %569 = vmatpush.msrb.mxu3 %v464_v56  ;;  %v706_v56 = vld [vmem:[%s1757_s2 + $0x128] sm:$0xff] }
  0x8b   :  { %546 = vmatpush.msrb.mxu2 %v532_v4 }
  0x8d   :  { %547 = vmatpush.msrb.mxu2 %v531_v11  ;;  %v682_v11 = vld [vmem:[%s1757_s2 + $0x280] sm:$0xff] }
  0x8e   :  { %v1298_v57 = vpop.f32.mrf.mxu0 }
  0x8f   :  { %v1300_v58 = vpop.f32.mrf.mxu1  ;;  %548 = vmatpush.msrb.mxu2 %v530_v23  ;;  %v676_v23 = vld [vmem:[%s1757_s2 + $0x250] sm:$0xff] }
  0x91   :  { %v1348_v13 = vpop.f32.mrf.mxu2 }
  0x92   :  { %v1350_v14 = vpop.f32.mrf.mxu3 }
  0x93   :  { %v171_v28 = vadd.f32 %v1350_v14, %v1348_v13  ;;  %v743_v13 = vld [vmem:[%s1757_s2 + $0x2b0] sm:$0xff] }
  0x96   :  { %v1302_v59 = vpop.f32.mrf.mxu0 }
  0x97   :  { %v1304_v60 = vpop.f32.mrf.mxu1 }
  0x98   :  { %v109_v14 = vadd.f32 %v1304_v60, %v1302_v59 }
  0x9e   :  { %v1306_v61 = vpop.f32.mrf.mxu0  ;;  %v293_v35 = vpop.f32.mrf.mxu2 }
  0x9f   :  { %v1308_v62 = vpop.f32.mrf.mxu1  ;;  %v329_v36 = vpop.f32.mrf.mxu3 }
  0xa0   :  { %v165_v44 = vadd.f32 %v1308_v62, %v1306_v61  ;;  %v578_v61 = vld [vmem:[%s1757_s2 + $0x98] sm:$0xff]  ;;  %v611_v62 = vld [vmem:[%s1757_s2 + $0x200] sm:$0xff] }
  0xa1   :  { %603 = vmatpush.msra.mxu0 %v578_v61  ;;  %633 = vmatpush.msra.mxu1 %v611_v62  ;;  %v739_v61 = vld [vmem:[%s1757_s2 + $0x290] sm:$0xff] }
  0xa3   :  { %604 = vmatpush.msra.mxu0 %v577_v9  ;;  %634 = vmatpush.msra.mxu1 %v610_v10 }
  0xa5   :  { %724 = vmatpush.msrb.mxu0 %v713_v16  ;;  %754 = vmatpush.msrb.mxu1 %v746_v19  ;;  %v649_v16 = vld [vmem:[%s1757_s2 + $0x118] sm:$0xff] }
  0xa6   :  { %v1310_v63 = vpop.f32.mrf.mxu0  ;;  %v296_v20 = vpop.f32.mrf.mxu2 }
  0xa7   :  { %v1312_v0 = vpop.f32.mrf.mxu1  ;;  %v332_v21 = vpop.f32.mrf.mxu3  ;;  %725 = vmatpush.msrb.mxu0 %v712_v24  ;;  %755 = vmatpush.msrb.mxu1 %v745_v25  ;;  %v646_v24 = vld [vmem:[%s1757_s2 + $0x100] sm:$0xff]  ;;  %v675_v25 = vld [vmem:[%s1757_s2 + $0x248] sm:$0xff] }
  0xa8   :  { %v168_v12 = vadd.f32 %v1312_v0, %v1310_v63 }
  0xa9   :  { %726 = vmatpush.msrb.mxu0 %v711_v26  ;;  %756 = vmatpush.msrb.mxu1 %v744_v27  ;;  %v644_v27 = vld [vmem:[%s1757_s2 + $0xf0] sm:$0xff] }
  0xab   :  { %757 = vmatpush.msrb.mxu1 %v743_v13 }
  0xad   :  { %758 = vmatpush.msrb.mxu1 %v742_v42 }
  0xae   :  { %v1326_v5 = vpop.f32.mrf.mxu0 }
  0xaf   :  { %v1328_v6 = vpop.f32.mrf.mxu1  ;;  %v218_v49 = vadd.f32 %v1326_v5, %v103_v43  ;;  %v463_v5 = vld [vmem:[%s1757_s2 + $0x170] sm:$0xff]  ;;  %v335_v45 = vpop.f32.mrf.mxu3  ;;  %759 = vmatpush.msrb.mxu1 %v741_v48 }
  0xb0   :  { %v254_v50 = vadd.f32 %v1328_v6, %v165_v44  ;;  %v106_v6 = vadd.f32 %v1300_v58, %v1298_v57  ;;  %570 = vmatpush.msrb.mxu3 %v463_v5  ;;  %v299_v44 = vpop.f32.mrf.mxu2  ;;  %v1021_v48 = vld [vmem:[%s1757_s2 + $0x2d0] ss:$0 sm:$0xff] }
  0xb1   :  { %v302_v1 = vadd.f32 %v293_v35, %v218_v49  ;;  %v710_v35 = vld [vmem:[%s1757_s2 + $0x148] sm:$0xff]  ;;  %760 = vmatpush.msrb.mxu1 %v740_v51 }
  0xb2   :  { %v338_v2 = vadd.f32 %v329_v36, %v254_v50  ;;  %571 = vmatpush.msrb.mxu3 %v462_v15  ;;  %727 = vmatpush.msrb.mxu0 %v710_v35  ;;  %v707_v50 = vld [vmem:[%s1757_s2 + $0x130] sm:$0xff]  ;;  %v679_v15 = vld [vmem:[%s1757_s2 + $0x268] sm:$0xff] }
  0xb3   :  { %761 = vmatpush.msrb.mxu1 %v739_v61  ;;  %v839_v51 = vld [vmem:[%s1757_s2 + $0x3c9] sm:$0xff] }
  0xb4   :  { %728 = vmatpush.msrb.mxu0 %v709_v41 }
  0xb6   :  { %v1358_v17 = vpop.f32.mrf.mxu0  ;;  %729 = vmatpush.msrb.mxu0 %v708_v47 }
  0xb7   :  { %v1360_v18 = vpop.f32.mrf.mxu1  ;;  %v219_v63 = vadd.f32 %v1358_v17, %v106_v6 }
  0xb8   :  { %v255_v0 = vadd.f32 %v1360_v18, %v168_v12  ;;  %v529_v18 = vld [vmem:[%s1757_s2 + $0x1c0] sm:$0xff]  ;;  %730 = vmatpush.msrb.mxu0 %v707_v50  ;;  %v823_v50 = vld [vmem:[%s1757_s2 + $0x349] sm:$0xff] }
  0xb9   :  { %v303_v29 = vadd.f32 %v296_v20, %v219_v63  ;;  %549 = vmatpush.msrb.mxu2 %v529_v18  ;;  %v648_v63 = vld [vmem:[%s1757_s2 + $0x110] sm:$0xff]  ;;  %v674_v18 = vld [vmem:[%s1757_s2 + $0x240] sm:$0xff] }
  0xba   :  { %v339_v30 = vadd.f32 %v332_v21, %v255_v0  ;;  %731 = vmatpush.msrb.mxu0 %v706_v56  ;;  %v678_v21 = vld [vmem:[%s1757_s2 + $0x260] sm:$0xff]  ;;  %v677_v0 = vld [vmem:[%s1757_s2 + $0x258] sm:$0xff]  ;;  %v779_v56 = vlaneseq }
  0xbb   :  { %550 = vmatpush.msrb.mxu2 %v528_v34 }
  0xbc   :  { %vm781_vm5 = vcmp.lt.s32.totalorder %v779_v56, 64  ;;  %vm791_vm6 = vcmp.ge.s32.totalorder %v779_v56, 64  ;;  %vm792_vm7 = vcmp.lt.s32.totalorder %v779_v56, 128 }
  0xbd   :  { %551 = vmatpush.msrb.mxu2 %v527_v40  ;;  %vm793_vm8 = vmand %vm791_vm6, %vm792_vm7 }
  0xbe   :  { %v1413_v38 = vpop.f32.mrf.mxu0 }
  0xbf   :  { %v1415_v39 = vpop.f32.mrf.mxu1  ;;  %v220_v59 = vadd.f32 %v1413_v38, %v109_v14 }
  0xc0   :  { %v256_v60 = vadd.f32 %v1415_v39, %v171_v28 }
  0xc1   :  { %v304_v38 = vadd.f32 %v299_v44, %v220_v59 }
  0xc2   :  { %v340_v39 = vadd.f32 %v335_v45, %v256_v60 }
  0xc6   :  { %v377_v7 = vpop.f32.mrf.mxu0 }
  0xc7   :  { %v413_v8 = vpop.f32.mrf.mxu1  ;;  %v386_v57 = vadd.f32 %v377_v7, %v302_v1  ;;  %v705_v1 = vld [vmem:[%s1757_s2 + $0x120] sm:$0xff] }
  0xc8   :  { %v422_v58 = vadd.f32 %v413_v8, %v338_v2  ;;  %v738_v2 = vld [vmem:[%s1757_s2 + $0x288] sm:$0xff]  ;;  %732 = vmatpush.msrb.mxu0 %v705_v1 }
  0xc9   :  { %762 = vmatpush.msrb.mxu1 %v738_v2 }
  0xca   :  { %v425_v22 = vmax.f32 %v386_v57, %v422_v58  ;;  %v680_v58 = vld [vmem:[%s1757_s2 + $0x270] sm:$0xff] }
  0xcc   :  { %v430_v17 = vadd.f32 %v1471_v3, %v425_v22  ;;  %v647_v22 = vld [vmem:[%s1757_s2 + $0x108] sm:$0xff] }
  0xce   :  { %v433_v31 = vmax.f32 %v430_v17, 0.0  ;;  %v380_v32 = vpop.f32.mrf.mxu0  ;;  %v645_v17 = vld [vmem:[%s1757_s2 + $0xf8] sm:$0xff] }
  0xcf   :  { %v416_v33 = vpop.f32.mrf.mxu1  ;;  %v387_v36 = vadd.f32 %v380_v32, %v303_v29  ;;  %v643_v29 = vld [vmem:[%s1757_s2 + $0xe8] sm:$0xff] }
  0xd0   :  { %437 = vst.msk [vmem:[#allocation2] sm:$0xff] %vm436_vm2, %v433_v31  ;;  %v423_v37 = vadd.f32 %v416_v33, %v339_v30  ;;  %v642_v30 = vld [vmem:[%s1757_s2 + $0xe0] sm:$0xff]  ;;  %v641_v31 = vld [vmem:[%s1757_s2 + $0xd8] sm:$0xff] }
  0xd2   :  { %v426_v43 = vmax.f32 %v387_v36, %v423_v37 }
  0xd4   :  { %v431_v46 = vadd.f32 %v1471_v3, %v426_v43 }
  0xd6   :  { %v434_v49 = vmax.f32 %v431_v46, 0.0  ;;  %v383_v52 = vpop.f32.mrf.mxu0 }
  0xd7   :  { %v419_v53 = vpop.f32.mrf.mxu1  ;;  %v388_v54 = vadd.f32 %v383_v52, %v304_v38  ;;  %v822_v52 = vld [vmem:[%s1757_s2 + $0x341] sm:$0xff] }
  0xd8   :  { %438 = vst.msk [vmem:[#allocation2 + $0x8] sm:$0xff] %vm436_vm2, %v434_v49  ;;  %v424_v55 = vadd.f32 %v419_v53, %v340_v39  ;;  %v838_v53 = vld [vmem:[%s1757_s2 + $0x3c1] sm:$0xff] }
  0xda   :  { %v427_v62 = vmax.f32 %v388_v54, %v424_v55  ;;  %v821_v54 = vld [vmem:[%s1757_s2 + $0x339] sm:$0xff] }
  0xdb   :  { %v837_v55 = vld [vmem:[%s1757_s2 + $0x3b9] sm:$0xff] }
  0xdc   :  { %v432_v4 = vadd.f32 %v1471_v3, %v427_v62  ;;  %v681_v3 = vld [vmem:[%s1757_s2 + $0x278] sm:$0xff] }
  0xde   :  { %v435_v5 = vmax.f32 %v432_v4, 0.0 }
  0xdf   :  { %v440_v6 = vld [vmem:[#allocation2] ss:$2 sm:$0xff]  ;;  %v444_v7 = vld [vmem:[#allocation2 + $0x1] ss:$2 sm:$0xff] }
  0xe0   :  { %439 = vst.msk [vmem:[#allocation2 + $0x10] sm:$0xff] %vm436_vm2, %v435_v5  ;;  %v447_v8 = vmax.f32 %v440_v6, %v444_v7  ;;  %v820_v6 = vld [vmem:[%s1757_s2 + $0x331] sm:$0xff] }
  0xe1   :  { %v836_v7 = vld [vmem:[%s1757_s2 + $0x3b1] sm:$0xff] }
  0xe2   :  { %449 = vst.msk [vmem:[#allocation3] sm:$0xff] %vm436_vm2, %v447_v8  ;;  %v819_v8 = vld [vmem:[%s1757_s2 + $0x329] sm:$0xff] }
  0xe7   :  { %v442_v9 = vld [vmem:[#allocation2 + $0x10] ss:$2 sm:$0xf]  ;;  %v446_v10 = vld [vmem:[#allocation2 + $0x11] ss:$2 sm:$0xf] }
  0xe8   :  { %v448_v12 = vmax.f32 %v442_v9, %v446_v10  ;;  %v835_v9 = vld [vmem:[%s1757_s2 + $0x3a9] sm:$0xff]  ;;  %v818_v10 = vld [vmem:[%s1757_s2 + $0x321] sm:$0xff] }
  0xe9   :  { %v452_v57 = vld [vmem:[#allocation3] sm:$0xff] }
  0xea   :  { %997 = vmatmul.msk.f32.vlgmr.msra.gmra.mxu3 %vm436_vm2, %v452_v57  ;;  %451 = vst.msk [vmem:[#allocation3 + $0x8] sm:$0xf] %vm450_vm3, %v448_v12  ;;  %v817_v12 = vld [vmem:[%s1757_s2 + $0x319] sm:$0xff] }
  0xeb   :  { %690 = vmatpush.msra.mxu3 %v682_v11  ;;  %v834_v11 = vld [vmem:[%s1757_s2 + $0x3a1] sm:$0xff] }
  0xed   :  { %691 = vmatpush.msra.mxu3 %v681_v3  ;;  %v816_v3 = vld [vmem:[%s1757_s2 + $0x311] sm:$0xff] }
  0xef   :  { %692 = vmatpush.msra.mxu3 %v680_v58  ;;  %v832_v58 = vld [vmem:[%s1757_s2 + $0x391] sm:$0xff] }
  0xf1   :  { %693 = vmatpush.msra.mxu3 %v679_v15  ;;  %v471_v19 = vld [vmem:[#allocation3 + $0x1] sm:$0xff]  ;;  %v815_v15 = vld [vmem:[%s1757_s2 + $0x309] sm:$0xff] }
  0xf2   :  { %v576_v20 = vld [vmem:[#allocation3 + $0x2] sm:$0xff]  ;;  %996 = vmatmul.msk.f32.vlgmr.msra.gmra.mxu2 %vm436_vm2, %v471_v19  ;;  %999 = vmatmul.msk.f32.vlgmr.msrb.gmra.mxu3 %vm436_vm2, %v452_v57  ;;  %v833_v57 = vld [vmem:[%s1757_s2 + $0x399] sm:$0xff] }
  0xf3   :  { %1000 = vmatmul.msk.f32.vlgmr.msra.gmra.mxu0 %vm436_vm2, %v576_v20  ;;  %1001 = vmatmul.msk.f32.vlgmr.msra.gmra.mxu1 %vm436_vm2, %v576_v20  ;;  %v704_v26 = vld [vmem:[#allocation3 + $0x4] sm:$0xff] }
  0xf4   :  { %660 = vmatpush.msra.mxu2 %v649_v16  ;;  %694 = vmatpush.msra.mxu3 %v678_v21  ;;  %v640_v28 = vld [vmem:[#allocation3 + $0x3] sm:$0xff]  ;;  %v813_v21 = vld [vmem:[%s1757_s2 + $0x2f9] sm:$0xff] }
  0xf5   :  { %v831_v16 = vld [vmem:[%s1757_s2 + $0x389] sm:$0xff]  ;;  %v830_v20 = vld [vmem:[%s1757_s2 + $0x381] sm:$0xff] }
  0xf6   :  { %661 = vmatpush.msra.mxu2 %v648_v63  ;;  %695 = vmatpush.msra.mxu3 %v677_v0  ;;  %v829_v63 = vld [vmem:[%s1757_s2 + $0x379] sm:$0xff]  ;;  %v812_v0 = vld [vmem:[%s1757_s2 + $0x2f1] sm:$0xff] }
  0xf8   :  { %662 = vmatpush.msra.mxu2 %v647_v22  ;;  %696 = vmatpush.msra.mxu3 %v676_v23  ;;  %v828_v22 = vld [vmem:[%s1757_s2 + $0x371] sm:$0xff]  ;;  %v811_v23 = vld [vmem:[%s1757_s2 + $0x2e9] sm:$0xff] }
  0xfa   :  { %663 = vmatpush.msra.mxu2 %v646_v24  ;;  %697 = vmatpush.msra.mxu3 %v675_v25  ;;  %v827_v24 = vld [vmem:[%s1757_s2 + $0x369] sm:$0xff]  ;;  %v810_v25 = vld [vmem:[%s1757_s2 + $0x2e1] sm:$0xff] }
  0xfb   :  { %998 = vmatmul.msk.f32.vlgmr.msrb.gmra.mxu2 %vm436_vm2, %v471_v19  ;;  %1004 = vmatmul.msk.f32.vlgmr.msrb.gmra.mxu0 %vm436_vm2, %v704_v26  ;;  %v814_v19 = vld [vmem:[%s1757_s2 + $0x301] sm:$0xff] }
  0xfc   :  { %664 = vmatpush.msra.mxu2 %v645_v17  ;;  %698 = vmatpush.msra.mxu3 %v674_v18  ;;  %v826_v17 = vld [vmem:[%s1757_s2 + $0x361] sm:$0xff]  ;;  %v809_v18 = vld [vmem:[%s1757_s2 + $0x2d9] sm:$0xff] }
  0xfd   :  { %1005 = vmatmul.msk.f32.vlgmr.msrb.gmra.mxu1 %vm436_vm2, %v704_v26  ;;  %1003 = vmatmul.msk.f32.vlgmr.msra.gmra.mxu3 %vm436_vm2, %v640_v28  ;;  %v825_v26 = vld [vmem:[%s1757_s2 + $0x359] sm:$0xff] }
  0xfe   :  { %665 = vmatpush.msra.mxu2 %v644_v27  ;;  %866 = vmatpush.msrb.mxu3 %v839_v51  ;;  %v808_v27 = vld [vmem:[%s1757_s2 + $0x2d1] sm:$0xff] }
 0x100   :  { %666 = vmatpush.msra.mxu2 %v643_v29  ;;  %867 = vmatpush.msrb.mxu3 %v838_v53 }
 0x102   :  { %667 = vmatpush.msra.mxu2 %v642_v30  ;;  %868 = vmatpush.msrb.mxu3 %v837_v55 }
 0x104   :  { %668 = vmatpush.msra.mxu2 %v641_v31  ;;  %869 = vmatpush.msrb.mxu3 %v836_v7 }
 0x105   :  { %1002 = vmatmul.msk.f32.vlgmr.msra.gmra.mxu2 %vm436_vm2, %v640_v28  ;;  %v824_v28 = vld [vmem:[%s1757_s2 + $0x351] sm:$0xff] }
 0x106   :  { %846 = vmatpush.msrb.mxu2 %v823_v50  ;;  %870 = vmatpush.msrb.mxu3 %v835_v9 }
 0x108   :  { %847 = vmatpush.msrb.mxu2 %v822_v52  ;;  %871 = vmatpush.msrb.mxu3 %v834_v11 }
 0x10a   :  { %848 = vmatpush.msrb.mxu2 %v821_v54  ;;  %872 = vmatpush.msrb.mxu3 %v833_v57  ;;  %v921_v57 = vand.u32 127, %v779_v56 }
 0x10c   :  { %849 = vmatpush.msrb.mxu2 %v820_v6  ;;  %873 = vmatpush.msrb.mxu3 %v832_v58 }
 0x10e   :  { %850 = vmatpush.msrb.mxu2 %v819_v8  ;;  %874 = vmatpush.msrb.mxu3 %v831_v16 }
 0x110   :  { %851 = vmatpush.msrb.mxu2 %v818_v10  ;;  %875 = vmatpush.msrb.mxu3 %v830_v20 }
 0x112   :  { %852 = vmatpush.msrb.mxu2 %v817_v12  ;;  %876 = vmatpush.msrb.mxu3 %v829_v63 }
 0x114   :  { %853 = vmatpush.msrb.mxu2 %v816_v3  ;;  %877 = vmatpush.msrb.mxu3 %v828_v22  ;;  %v922_v3 = vcvt.s32.f32 %v921_v57 }
 0x116   :  { %854 = vmatpush.msrb.mxu2 %v815_v15  ;;  %878 = vmatpush.msrb.mxu3 %v827_v24  ;;  %v923_v58 = vsub.f32 1.0, %v922_v3 }
 0x118   :  { %855 = vmatpush.msrb.mxu2 %v814_v19  ;;  %879 = vmatpush.msrb.mxu3 %v826_v17 }
 0x11a   :  { %856 = vmatpush.msrb.mxu2 %v813_v21  ;;  %880 = vmatpush.msrb.mxu3 %v825_v26 }
 0x11c   :  { %857 = vmatpush.msrb.mxu2 %v812_v0  ;;  %881 = vmatpush.msrb.mxu3 %v824_v28 }
 0x11e   :  { %858 = vmatpush.msrb.mxu2 %v811_v23 }
 0x120   :  { %859 = vmatpush.msrb.mxu2 %v810_v25 }
 0x122   :  { %860 = vmatpush.msrb.mxu2 %v809_v18 }
 0x124   :  { %861 = vmatpush.msrb.mxu2 %v808_v27 }
 0x16d   :  { %v524_v32 = vpop.f32.mrf.mxu3 }
 0x170   :  { %v606_v14 = vpop.f32.mrf.mxu0  ;;  %v636_v36 = vpop.f32.mrf.mxu1 }
 0x175   :  { %v501_v33 = vpop.f32.mrf.mxu2  ;;  %v573_v34 = vpop.f32.mrf.mxu3 }
 0x176   :  { %v525_v37 = vadd.f32 %v524_v32, %v501_v33 }
 0x178   :  { %v609_v59 = vadd.f32 %v606_v14, %v525_v37  ;;  %v734_v44 = vpop.f32.mrf.mxu0  ;;  %v887_v37 = vld [vmem:[%s1757_s2 + $0x3d2] sm:$0x1] }
 0x17a   :  { %v764_v45 = vpop.f32.mrf.mxu1 }
 0x17e   :  { %v553_v35 = vpop.f32.mrf.mxu2 }
 0x17f   :  { %v574_v13 = vadd.f32 %v573_v34, %v553_v35  ;;  %v840_v34 = vld [vmem:[%s1757_s2 + $0x3d1] sm:$0x1] }
 0x180   :  { %v700_v41 = vpop.f32.mrf.mxu3 }
 0x181   :  { %v639_v40 = vadd.f32 %v636_v36, %v574_v13 }
 0x183   :  { %v703_v42 = vadd.f32 %v700_v41, %v639_v40 }
 0x185   :  { %v767_v46 = vadd.f32 %v764_v45, %v703_v42  ;;  %v1049_v45 = vmov 0  }
 0x186   :  { %1017 = vset.pattern.permute.xlu1 %v1049_v45  ;;  %1018 = vset.pattern.permute.xlu2 %v1049_v45 }
 0x187   :  { %1019 = vset.pattern.permute.xlu0 %v1049_v45 }
 0x188   :  { %v670_v60 = vpop.f32.mrf.mxu2 }
 0x189   :  { %v673_v43 = vadd.f32 %v670_v60, %v609_v59  ;;  %v893_v59 = vld [vmem:[%s1757_s2 + $0x3d3] sm:$0x1]  ;;  %s1050_s2 = smov [#allocation6]  }
 0x18a   :  { %s945_s11 = sshll.u32 %s1050_s2, 4  ;;  %s946_s11 = int_to_ptr.vmem [resolvable:$true] %s945_s11 }
 0x18b   :  { %v737_v47 = vadd.f32 %v734_v44, %v673_v43 }
 0x18d   :  { %v768_v38 = vmax.f32 %v737_v47, %v767_v46 }
 0x18f   :  { %v771_v39 = vadd.f32 %v1021_v48, %v768_v38 }
 0x191   :  { %v772_v49 = vmax.f32 %v771_v39, 0.0 }
 0x193   :  { %774 = vst.msk [vmem:[#allocation4] sm:$0xff] %vm773_vm4, %v772_v49 }
 0x19a   :  { %v775_v61 = vld [vmem:[#allocation4] ss:$2 sm:$0xf]  ;;  %v777_v62 = vld [vmem:[#allocation4 + $0x1] ss:$2 sm:$0xf] }
 0x19b   :  { %v778_v1 = vmax.f32 %v775_v61, %v777_v62 }
 0x19d   :  { %785 = vst [vmem:[#allocation1] sm:$0xff] %v778_v1 }
 0x19e   :  { %783 = vst.msk [vmem:[#allocation5] sm:$0x1] %vm781_vm5, %v778_v1 }
 0x1a4   :  { %v787_v2 = vld [vmem:[#allocation1 + $0x1] ss:$9 sm:$0xff] }
 0x1a5   :  { %788 = vrot.lane.b32.xlu0 %v787_v2, %s1048_s10  ;;  %795 = vst [vmem:[#allocation1] sm:$0xff] %v778_v1 }
 0x1ac   :  { %v797_v4 = vld [vmem:[#allocation1 + $0x2] ss:$9 sm:$0xff] }
 0x1ad   :  { %800 = vst [vmem:[#allocation1] sm:$0xff] %v778_v1 }
 0x1ae   :  { %799 = vst.msk [vmem:[#allocation5 + $0x1] sm:$0x1] %vm781_vm5, %v797_v4 }
 0x1b4   :  { %v802_v5 = vld [vmem:[#allocation1 + $0x3] ss:$9 sm:$0xff] }
 0x1b5   :  { %803 = vrot.lane.b32.xlu0 %v802_v5, %s1048_s10 }
 0x217   :  { %v789_v29 = vpop.permute.xlu0 %788 }
 0x218   :  { %794 = vst.msk [vmem:[#allocation5] sm:$0x1] %vm793_vm8, %v789_v29 }
 0x227   :  { %v804_v30 = vpop.permute.xlu0 %803 }
 0x228   :  { %806 = vst.msk [vmem:[#allocation5 + $0x1] sm:$0x1] %vm793_vm8, %v804_v30 }
 0x22f   :  { %v807_v31 = vld [vmem:[#allocation5] sm:$0x3] }
 0x230   :  { %v842_v32 = vperm.slane %v807_v31, 0  ;;  %v843_v33 = vperm.slane %v807_v31, 1 }
 0x232   :  { %862 = vmatmul.f32.vlgmr.msrb.gmra.mxu2 %v842_v32  ;;  %882 = vmatmul.f32.vlgmr.msrb.gmra.mxu3 %v843_v33 }
 0x2b5   :  { %v863_v35 = vpop.f32.mrf.mxu2  ;;  %v883_v14 = vpop.f32.mrf.mxu3 }
 0x2b6   :  { %v864_v13 = vadd.f32 %v863_v35, %v840_v34 }
 0x2b8   :  { %v884_v36 = vadd.f32 %v883_v14, %v864_v13 }
 0x2ba   :  { %v886_v40 = vmax.f32 %v884_v36, 0.0 }
 0x2bc   :  { %v888_v41 = vmul.f32 %v887_v37, %v886_v40 }
 0x2be   :  { %v890_v42 = vsel %vm889_vm9, %v888_v41, 0.0 }
 0x2bf   :  { %891 = vadd.xlane.f32.xlu1 %v890_v42 }
 0x332   :  { %v892_v60 = vpop.xlane.xlu1 %891 }
 0x333   :  { %v894_v43 = vadd.f32 %v893_v59, %v892_v60 }
 0x335   :  { %v895_v44 = vmul.f32 0.31830987, %v894_v43 }
 0x337   :  { %v896_v46 = vadd.f32 0.5, %v895_v44 }
 0x339   :  { %v897_v47 = vfloor.f32 %v896_v46 }
 0x33b   :  { %v898_v48 = vmul.f32 3.1415927, %v897_v47  ;;  %v900_v51 = vmul.f32 0.5, %v897_v47 }
 0x33d   :  { %v899_v38 = vsub.f32 %v894_v43, %v898_v48  ;;  %v901_v54 = vfloor.f32 %v900_v51 }
 0x33f   :  { %v905_v39 = vmul.f32 %v899_v38, %v899_v38  ;;  %v902_v62 = vsub.f32 %v900_v51, %v901_v54 }
 0x341   :  { %v906_v49 = vmul.f32 -2.5052108e-08, %v905_v39  ;;  %v903_v5 = vmul.f32 4.0, %v902_v62 }
 0x343   :  { %v907_v50 = vadd.f32 2.7557319e-06, %v906_v49  ;;  %v904_v8 = vsub.f32 1.0, %v903_v5 }
 0x345   :  { %v908_v52 = vmul.f32 %v907_v50, %v905_v39 }
 0x347   :  { %v909_v53 = vadd.f32 -0.0001984127, %v908_v52 }
 0x349   :  { %v910_v55 = vmul.f32 %v909_v53, %v905_v39 }
 0x34b   :  { %v911_v61 = vadd.f32 0.008333334, %v910_v55 }
 0x34d   :  { %v912_v1 = vmul.f32 %v911_v61, %v905_v39 }
 0x34f   :  { %v913_v2 = vadd.f32 -0.16666667, %v912_v1 }
 0x351   :  { %v914_v4 = vmul.f32 %v913_v2, %v905_v39 }
 0x353   :  { %v915_v6 = vadd.f32 1.0, %v914_v4 }
 0x355   :  { %v916_v7 = vmul.f32 %v915_v6, %v899_v38 }
 0x357   :  { %v917_v9 = vmul.f32 %v916_v7, %v904_v8 }
 0x359   :  { %v918_v10 = vadd.f32 1.0, %v917_v9 }
 0x35b   :  { %v919_v11 = vmul.f32 0.5, %v918_v10 }
 0x35d   :  { %926 = vperm.xlu1 %1017, %v919_v11   ;;  %v930_v12 = vsub.f32 1.0, %v919_v11 }
 0x35f   :  { %933 = vperm.xlu2 %1018, %v930_v12  }
 0x3b9   :  { %v934_v15 = vpop.permute.xlu2 %933 }
 0x3ba   :  { %v936_v19 = vmul.f32 %v934_v15, %v922_v3 }
 0x3cf   :  { %v927_v16 = vpop.permute.xlu1 %926 }
 0x3d0   :  { %v929_v20 = vmul.f32 %v927_v16, %v923_v58 }
 0x3d2   :  { %v937_v21 = vadd.f32 %v936_v19, %v929_v20 }
 0x3d4   :  { %939 = vst.msk [vmem:[#allocation6] sm:$0x1] %vm938_vm10, %v937_v21 }
 0x3d5   :  { %950 = dma.vmem_to_hbm [thread:$0]  %s946_s11, 16, %s948_s0, [#allocation7]  }
 0x3d6   :  { %1046 = dma.done.wait [#allocation7], 16  }
 0x3d7   :  { %1047 = vsyncadd [#allocation7], 4294967280 }
 0x3d8   :  { %955 = vsyncpa [#allocation7], 1 }

</bundles_post_ra>
